<compile_context>
chip_gen: v5e
topology: v5e:2x2
jax: 0.10.0
libtpu: 0.0.40
codegen_flags: <defaults>
</compile_context>

<pallas_src>
import jax
import jax.numpy as jnp
from jax import lax
from jax.experimental import pallas as pl
from jax.experimental.pallas import tpu as pltpu

N_STEPS = 16        # fixed-step RK4 steps between t_span[0] and t_span[1]
LANE = 128          # TPU lane width -> pad feature/hidden dims for unmasked stores
SUBLANE = 8
TANH_IN_BF16 = True  # set False on v5e (no bf16 VPU/EUP); True for v6e/v7x


def _round_up(n, m):
    return ((n + m - 1) // m) * m


# --------------------------- Pallas kernel ---------------------------------------
def _node_rk4_kernel(ts_ref, x_ref, w1_ref, wt_ref, w2_ref, b2_ref, out_ref):
    """Integrate dx/dt = f(t, x) with RK4 entirely in VMEM for one batch tile.

    ts_ref: (2,) f32 in SMEM (scalar prefetch)  -> [t0, t1]
    x_ref : (tb, Dp) f32, lane-dense; column D holds the constant 1.0 (b1 fold).
    w1_ref: (Dp, Hp) bf16 (row D = b1), wt_ref: (1, Hp) f32,
    w2_ref: (Hp, Dp) bf16,              b2_ref: (1, Dp) f32.
    """
    t0 = ts_ref[0]
    t1 = ts_ref[1]
    dt = (t1 - t0) / jnp.float32(N_STEPS)
    half_dt = 0.5 * dt
    dt_6 = dt / 6.0

    # Weights / rows loaded once; stay resident for the whole integration.
    w1 = w1_ref[...]          # bf16
    w2 = w2_ref[...]          # bf16
    wt = wt_ref[...]          # (1, Hp) f32
    b2 = b2_ref[...]          # (1, Dp) f32

    def f(t, x):
        # bf16 operands -> single MXU pass; f32 accumulation.  b1 arrives via the ones
        # column of x and row D of w1, so no explicit bias add here.
        pre = jnp.dot(x.astype(jnp.bfloat16), w1, preferred_element_type=jnp.float32)
        # Scale w_t by t on the (1, Hp) row, then sublane-broadcast add.
        pre = pre + t * wt
        if TANH_IN_BF16:
            h = jnp.tanh(pre.astype(jnp.bfloat16))
        else:
            h = jnp.tanh(pre).astype(jnp.bfloat16)
        out = jnp.dot(h, w2, preferred_element_type=jnp.float32)
        return out + b2

    def body(i, x):
        t = t0 + i.astype(jnp.float32) * dt
        k1 = f(t, x)
        k2 = f(t + half_dt, x + half_dt * k1)
        k3 = f(t + half_dt, x + half_dt * k2)
        k4 = f(t + dt, x + dt * k3)
        return x + dt_6 * (k1 + 2.0 * k2 + 2.0 * k3 + k4)

    out_ref[...] = lax.fori_loop(0, N_STEPS, body, x_ref[...])


# --------------------------- padding / layout helpers ----------------------------
def _build_padded(x0, params, tb):
    """Lane-dense, zero-padded operands with b1 folded into W1 via a ones column."""
    w1, b1, wt, w2, b2 = params
    B, D = x0.shape
    H = w1.shape[1]
    Dp = _round_up(D + 1, LANE)   # +1 column for the b1 fold
    Hp = _round_up(H, LANE)
    Bp = _round_up(B, tb)
    f32, bf16 = jnp.float32, jnp.bfloat16

    x0_p = jnp.zeros((Bp, Dp), f32)
    x0_p = x0_p.at[:B, :D].set(x0.astype(f32))
    x0_p = x0_p.at[:B, D].set(1.0)          # ones column; its derivative stays exactly 0

    w1_p = jnp.zeros((Dp, Hp), f32)
    w1_p = w1_p.at[:D, :H].set(w1.astype(f32))
    w1_p = w1_p.at[D, :H].set(b1.reshape(-1).astype(f32))   # fold b1 into W1 row D
    w1_p = w1_p.astype(bf16)

    wt_p = jnp.zeros((1, Hp), f32).at[:, :H].set(wt.astype(f32).reshape(1, H))
    w2_p = jnp.zeros((Hp, Dp), f32).at[:H, :D].set(w2.astype(f32)).astype(bf16)
    # NOTE: w2_p[:, D:] and b2_p[:, D:] MUST stay exact zeros so the ones column's
    # derivative is 0 and it remains 1.0 through all RK4 stages.
    b2_p = jnp.zeros((1, Dp), f32).at[:, :D].set(b2.astype(f32).reshape(1, D))
    return x0_p, w1_p, wt_p, w2_p, b2_p, Bp, Dp, Hp


def _pick_batch_tile(B):
    # Prefer >=2 batch tiles so v7x's two TensorCores both get work; on 1-TC chips
    # (v5e/v6e) the extra grid step costs ~0.35us — negligible.  Cap the tile for VMEM
    # headroom (v7x physical VMEM is 64 MiB).
    tb = max(SUBLANE, _round_up(pl.cdiv(B, 2), SUBLANE))
    return min(tb, 512)


# --------------------------- wrapper ----------------------------------------------
def integrated_node_forward(x0, t_span, params, *, batch_tile=None):
    """Pallas wrapper: integrate x0 from t_span[0] to t_span[1]; returns (B, D) f32."""
    B, D = x0.shape
    tb = _pick_batch_tile(B) if batch_tile is None else batch_tile
    x0_p, w1_p, wt_p, w2_p, b2_p, Bp, Dp, Hp = _build_padded(x0, params, tb)

    # Explicit VMEM budget: in/out tiles double-buffered + resident weights + loop temps.
    tile_bytes = tb * Dp * 4
    weight_bytes = (Dp * Hp + Hp * Dp) * 2
    vmem_need = 4 * tile_bytes + 2 * weight_bytes + 16 * tb * max(Dp, Hp) * 4
    vmem_limit = int(min(max(2 * vmem_need, 8 * 1024 * 1024), 32 * 1024 * 1024))

    grid = (Bp // tb,)
    grid_spec = pltpu.PrefetchScalarGridSpec(
        num_scalar_prefetch=1,                               # t_span -> SMEM
        grid=grid,
        in_specs=[
            pl.BlockSpec((tb, Dp), lambda i, ts: (i, 0)),    # x0 batch tile
            pl.BlockSpec((Dp, Hp), lambda i, ts: (0, 0)),    # W1 (bf16, resident)
            pl.BlockSpec((1, Hp), lambda i, ts: (0, 0)),     # w_t row
            pl.BlockSpec((Hp, Dp), lambda i, ts: (0, 0)),    # W2 (bf16, resident)
            pl.BlockSpec((1, Dp), lambda i, ts: (0, 0)),     # b2 row
        ],
        out_specs=pl.BlockSpec((tb, Dp), lambda i, ts: (i, 0)),
    )

    out_p = pl.pallas_call(
        _node_rk4_kernel,
        out_shape=jax.ShapeDtypeStruct((Bp, Dp), jnp.float32),
        grid_spec=grid_spec,
        compiler_params=pltpu.CompilerParams(
            dimension_semantics=("parallel",),   # shard batch tiles across TCs (v7x)
            vmem_limit_bytes=vmem_limit,
        ),
    )(t_span.astype(jnp.float32), x0_p, w1_p, wt_p, w2_p, b2_p)

    return out_p[:B, :D]


# ---------------- references ------------------------------------------------------
def integrated_node_reference_f32(x0, t_span, params):
    """Strict-f32 RK4 mirroring the PyTorch module semantics (precision pinned)."""
    w1, b1, wt, w2, b2 = [p.astype(jnp.float32) for p in params]

    def f(t, x):
        h = jnp.tanh(jnp.dot(x, w1, precision=lax.Precision.HIGHEST) + t * wt + b1)
        return jnp.dot(h, w2, precision=lax.Precision.HIGHEST) + b2

    t0, t1 = t_span[0].astype(jnp.float32), t_span[1].astype(jnp.float32)
    dt = (t1 - t0) / N_STEPS
    x = x0.astype(jnp.float32)
    for i in range(N_STEPS):
        t = t0 + i * dt
        k1 = f(t, x)
        k2 = f(t + 0.5 * dt, x + 0.5 * dt * k1)
        k3 = f(t + 0.5 * dt, x + 0.5 * dt * k2)
        k4 = f(t + dt, x + dt * k3)
        x = x + (dt / 6.0) * (k1 + 2.0 * k2 + 2.0 * k3 + k4)
    return x


def integrated_node_reference_matched(x0, t_span, params):
    """Pure-JAX reference with the SAME bf16/padding/fold scheme as the kernel."""
    B, D = x0.shape
    x0_p, w1_p, wt_p, w2_p, b2_p, _, _, _ = _build_padded(x0, params, SUBLANE)

    def f(t, x):
        pre = jnp.dot(x.astype(jnp.bfloat16), w1_p, preferred_element_type=jnp.float32)
        pre = pre + t * wt_p
        if TANH_IN_BF16:
            h = jnp.tanh(pre.astype(jnp.bfloat16))
        else:
            h = jnp.tanh(pre).astype(jnp.bfloat16)
        return jnp.dot(h, w2_p, preferred_element_type=jnp.float32) + b2_p

    t0, t1 = t_span[0].astype(jnp.float32), t_span[1].astype(jnp.float32)
    dt = (t1 - t0) / N_STEPS
    x = x0_p
    for i in range(N_STEPS):
        t = t0 + i * dt
        k1 = f(t, x)
        k2 = f(t + 0.5 * dt, x + 0.5 * dt * k1)
        k3 = f(t + 0.5 * dt, x + 0.5 * dt * k2)
        k4 = f(t + dt, x + dt * k3)
        x = x + (dt / 6.0) * (k1 + 2.0 * k2 + 2.0 * k3 + k4)
    return x[:B, :D]


if __name__ == "__main__":
    # Many ODE instances per call so the MXU M dimension is filled and the batch grid
    # (2 tiles of 128) exercises the parallel dimension semantics.
    B, D, H = 256, 32, 64  # batch, state features, hidden width of dynamics MLP

    key = jax.random.PRNGKey(0)
    k_x, k_w1, k_b1, k_wt, k_w2, k_b2 = jax.random.split(key, 6)

    # Deterministic synthetic parameters (scaled small so the ODE stays tame).
    w1 = jax.random.normal(k_w1, (D, H), jnp.float32) * 0.1
    b1 = jax.random.normal(k_b1, (1, H), jnp.float32) * 0.1
    wt = jax.random.normal(k_wt, (1, H), jnp.float32) * 0.1
    w2 = jax.random.normal(k_w2, (H, D), jnp.float32) * 0.1
    b2 = jax.random.normal(k_b2, (1, D), jnp.float32) * 0.1
    params = (w1, b1, wt, w2, b2)

    x0 = jax.random.normal(k_x, (B, D), jnp.float32)
    # Default t_span in the PyTorch module: (0.0, 1.0)
    t_span = jnp.array([0.0, 1.0], dtype=jnp.float32)

    out = integrated_node_forward(x0, t_span, params)
    out = jax.block_until_ready(out)
    assert out.shape == (B, D) and out.dtype == jnp.float32

    # (1) Structural check: matches a pure-JAX reference using the identical bf16 /
    #     padding / bias-fold scheme (tolerance only for tanh-rounding / accumulation
    #     order differences).
    ref_matched = integrated_node_reference_matched(x0, t_span, params)
    assert jnp.allclose(out, ref_matched, atol=5e-3, rtol=5e-3), \
        "Pallas kernel mismatch vs matched-precision reference"

    # (2) Semantic check vs the strict-f32 PyTorch-equivalent reference; tolerance
    #     accounts for bf16 matmul/tanh operands accumulated over 16 RK4 steps.
    ref_f32 = integrated_node_reference_f32(x0, t_span, params)
    assert jnp.allclose(out, ref_f32, atol=5e-2, rtol=5e-2), \
        "Pallas kernel mismatch vs f32 reference"

    print("KERNEL_OK")
</pallas_src>

<mosaic_0001>
module attributes {stable_mosaic.version = 11 : i64} {
  func.func @_node_rk4_kernel(%arg0: i32, %arg1: memref<2xf32, #tpu.memory_space<smem>>, %arg2: memref<128x128xf32, #tpu.memory_space<vmem>>, %arg3: memref<128x128xbf16, #tpu.memory_space<vmem>>, %arg4: memref<1x128xf32, #tpu.memory_space<vmem>>, %arg5: memref<128x128xbf16, #tpu.memory_space<vmem>>, %arg6: memref<1x128xf32, #tpu.memory_space<vmem>>, %arg7: memref<128x128xf32, #tpu.memory_space<vmem>>) attributes {dimension_semantics = [#tpu.dimension_semantics<parallel>], iteration_bounds = array<i64: 2>, scalar_prefetch = 1 : i64, scratch_operands = 0 : i64, tpu.core_type = #tpu.core_type<tc>, window_params = [{transform_indices = @transform_0, window_bounds = array<i64: 128, 128>}, {pipeline_mode = #tpu.pipeline_mode<synchronous>, transform_indices = @transform_1, window_bounds = array<i64: 128, 128>}, {pipeline_mode = #tpu.pipeline_mode<synchronous>, transform_indices = @transform_2, window_bounds = array<i64: 1, 128>}, {pipeline_mode = #tpu.pipeline_mode<synchronous>, transform_indices = @transform_3, window_bounds = array<i64: 128, 128>}, {pipeline_mode = #tpu.pipeline_mode<synchronous>, transform_indices = @transform_4, window_bounds = array<i64: 1, 128>}, {transform_indices = @transform_5, window_bounds = array<i64: 128, 128>}]} {
    %c0 = arith.constant 0 : index
    %0 = memref.load %arg1[%c0] : memref<2xf32, #tpu.memory_space<smem>>
    %c1 = arith.constant 1 : index
    %1 = memref.load %arg1[%c1] : memref<2xf32, #tpu.memory_space<smem>>
    %2 = arith.subf %1, %0 : f32
    %cst = arith.constant 1.600000e+01 : f32
    %3 = arith.divf %2, %cst : f32
    %cst_0 = arith.constant 5.000000e-01 : f32
    %4 = arith.mulf %cst_0, %3 : f32
    %cst_1 = arith.constant 6.000000e+00 : f32
    %5 = arith.divf %3, %cst_1 : f32
    %c0_2 = arith.constant 0 : index
    %c0_3 = arith.constant 0 : index
    %6 = vector.load %arg3[%c0_2, %c0_3] : memref<128x128xbf16, #tpu.memory_space<vmem>>, vector<128x128xbf16>
    %c0_4 = arith.constant 0 : index
    %c0_5 = arith.constant 0 : index
    %7 = vector.load %arg5[%c0_4, %c0_5] : memref<128x128xbf16, #tpu.memory_space<vmem>>, vector<128x128xbf16>
    %c0_6 = arith.constant 0 : index
    %c0_7 = arith.constant 0 : index
    %8 = vector.load %arg4[%c0_6, %c0_7] : memref<1x128xf32, #tpu.memory_space<vmem>>, vector<1x128xf32>
    %c0_8 = arith.constant 0 : index
    %c0_9 = arith.constant 0 : index
    %9 = vector.load %arg6[%c0_8, %c0_9] : memref<1x128xf32, #tpu.memory_space<vmem>>, vector<1x128xf32>
    %c0_10 = arith.constant 0 : index
    %c0_11 = arith.constant 0 : index
    %10 = vector.load %arg2[%c0_10, %c0_11] : memref<128x128xf32, #tpu.memory_space<vmem>>, vector<128x128xf32>
    %c0_i32 = arith.constant 0 : i32
    %c16_i32 = arith.constant 16 : i32
    %11 = arith.addi %c0_i32, %c16_i32 : i32
    %c1_i32 = arith.constant 1 : i32
    %12 = scf.for %arg8 = %c0_i32 to %11 step %c1_i32 iter_args(%arg9 = %10) -> (vector<128x128xf32>)  : i32 {
      %14 = arith.sitofp %arg8 : i32 to f32
      %15 = arith.mulf %14, %3 : f32
      %16 = arith.addf %0, %15 : f32
      %17 = arith.truncf %arg9 : vector<128x128xf32> to vector<128x128xbf16>
      %cst_15 = arith.constant dense<0.000000e+00> : vector<128x128xf32>
      %18 = tpu.matmul %17, %6, %cst_15 {dimension_numbers = #tpu.dot_dimension_numbers<[1], [0], [0], [1], [0, 0, 1, 1], [], []>} : vector<128x128xbf16>, vector<128x128xbf16>, vector<128x128xf32> -> vector<128x128xf32>
      %19 = vector.broadcast %16 : f32 to vector<1x128xf32>
      %20 = arith.mulf %19, %8 : vector<1x128xf32>
      %21 = vector.broadcast %20 : vector<1x128xf32> to vector<128x128xf32>
      %22 = arith.addf %18, %21 : vector<128x128xf32>
      %23 = arith.truncf %22 : vector<128x128xf32> to vector<128x128xbf16>
      %24 = math.tanh %23 : vector<128x128xbf16>
      %cst_16 = arith.constant dense<0.000000e+00> : vector<128x128xf32>
      %25 = tpu.matmul %24, %7, %cst_16 {dimension_numbers = #tpu.dot_dimension_numbers<[1], [0], [0], [1], [0, 0, 1, 1], [], []>} : vector<128x128xbf16>, vector<128x128xbf16>, vector<128x128xf32> -> vector<128x128xf32>
      %26 = vector.broadcast %9 : vector<1x128xf32> to vector<128x128xf32>
      %27 = arith.addf %25, %26 : vector<128x128xf32>
      %28 = arith.addf %16, %4 : f32
      %29 = vector.broadcast %4 : f32 to vector<128x128xf32>
      %30 = arith.mulf %29, %27 : vector<128x128xf32>
      %31 = arith.addf %arg9, %30 : vector<128x128xf32>
      %32 = arith.truncf %31 : vector<128x128xf32> to vector<128x128xbf16>
      %cst_17 = arith.constant dense<0.000000e+00> : vector<128x128xf32>
      %33 = tpu.matmul %32, %6, %cst_17 {dimension_numbers = #tpu.dot_dimension_numbers<[1], [0], [0], [1], [0, 0, 1, 1], [], []>} : vector<128x128xbf16>, vector<128x128xbf16>, vector<128x128xf32> -> vector<128x128xf32>
      %34 = vector.broadcast %28 : f32 to vector<1x128xf32>
      %35 = arith.mulf %34, %8 : vector<1x128xf32>
      %36 = vector.broadcast %35 : vector<1x128xf32> to vector<128x128xf32>
      %37 = arith.addf %33, %36 : vector<128x128xf32>
      %38 = arith.truncf %37 : vector<128x128xf32> to vector<128x128xbf16>
      %39 = math.tanh %38 : vector<128x128xbf16>
      %cst_18 = arith.constant dense<0.000000e+00> : vector<128x128xf32>
      %40 = tpu.matmul %39, %7, %cst_18 {dimension_numbers = #tpu.dot_dimension_numbers<[1], [0], [0], [1], [0, 0, 1, 1], [], []>} : vector<128x128xbf16>, vector<128x128xbf16>, vector<128x128xf32> -> vector<128x128xf32>
      %41 = vector.broadcast %9 : vector<1x128xf32> to vector<128x128xf32>
      %42 = arith.addf %40, %41 : vector<128x128xf32>
      %43 = arith.addf %16, %4 : f32
      %44 = vector.broadcast %4 : f32 to vector<128x128xf32>
      %45 = arith.mulf %44, %42 : vector<128x128xf32>
      %46 = arith.addf %arg9, %45 : vector<128x128xf32>
      %47 = arith.truncf %46 : vector<128x128xf32> to vector<128x128xbf16>
      %cst_19 = arith.constant dense<0.000000e+00> : vector<128x128xf32>
      %48 = tpu.matmul %47, %6, %cst_19 {dimension_numbers = #tpu.dot_dimension_numbers<[1], [0], [0], [1], [0, 0, 1, 1], [], []>} : vector<128x128xbf16>, vector<128x128xbf16>, vector<128x128xf32> -> vector<128x128xf32>
      %49 = vector.broadcast %43 : f32 to vector<1x128xf32>
      %50 = arith.mulf %49, %8 : vector<1x128xf32>
      %51 = vector.broadcast %50 : vector<1x128xf32> to vector<128x128xf32>
      %52 = arith.addf %48, %51 : vector<128x128xf32>
      %53 = arith.truncf %52 : vector<128x128xf32> to vector<128x128xbf16>
      %54 = math.tanh %53 : vector<128x128xbf16>
      %cst_20 = arith.constant dense<0.000000e+00> : vector<128x128xf32>
      %55 = tpu.matmul %54, %7, %cst_20 {dimension_numbers = #tpu.dot_dimension_numbers<[1], [0], [0], [1], [0, 0, 1, 1], [], []>} : vector<128x128xbf16>, vector<128x128xbf16>, vector<128x128xf32> -> vector<128x128xf32>
      %56 = vector.broadcast %9 : vector<1x128xf32> to vector<128x128xf32>
      %57 = arith.addf %55, %56 : vector<128x128xf32>
      %58 = arith.addf %16, %3 : f32
      %59 = vector.broadcast %3 : f32 to vector<128x128xf32>
      %60 = arith.mulf %59, %57 : vector<128x128xf32>
      %61 = arith.addf %arg9, %60 : vector<128x128xf32>
      %62 = arith.truncf %61 : vector<128x128xf32> to vector<128x128xbf16>
      %cst_21 = arith.constant dense<0.000000e+00> : vector<128x128xf32>
      %63 = tpu.matmul %62, %6, %cst_21 {dimension_numbers = #tpu.dot_dimension_numbers<[1], [0], [0], [1], [0, 0, 1, 1], [], []>} : vector<128x128xbf16>, vector<128x128xbf16>, vector<128x128xf32> -> vector<128x128xf32>
      %64 = vector.broadcast %58 : f32 to vector<1x128xf32>
      %65 = arith.mulf %64, %8 : vector<1x128xf32>
      %66 = vector.broadcast %65 : vector<1x128xf32> to vector<128x128xf32>
      %67 = arith.addf %63, %66 : vector<128x128xf32>
      %68 = arith.truncf %67 : vector<128x128xf32> to vector<128x128xbf16>
      %69 = math.tanh %68 : vector<128x128xbf16>
      %cst_22 = arith.constant dense<0.000000e+00> : vector<128x128xf32>
      %70 = tpu.matmul %69, %7, %cst_22 {dimension_numbers = #tpu.dot_dimension_numbers<[1], [0], [0], [1], [0, 0, 1, 1], [], []>} : vector<128x128xbf16>, vector<128x128xbf16>, vector<128x128xf32> -> vector<128x128xf32>
      %71 = vector.broadcast %9 : vector<1x128xf32> to vector<128x128xf32>
      %72 = arith.addf %70, %71 : vector<128x128xf32>
      %cst_23 = arith.constant 2.000000e+00 : f32
      %73 = vector.broadcast %cst_23 : f32 to vector<128x128xf32>
      %74 = arith.mulf %73, %42 : vector<128x128xf32>
      %75 = arith.addf %27, %74 : vector<128x128xf32>
      %cst_24 = arith.constant 2.000000e+00 : f32
      %76 = vector.broadcast %cst_24 : f32 to vector<128x128xf32>
      %77 = arith.mulf %76, %57 : vector<128x128xf32>
      %78 = arith.addf %75, %77 : vector<128x128xf32>
      %79 = arith.addf %78, %72 : vector<128x128xf32>
      %80 = vector.broadcast %5 : f32 to vector<128x128xf32>
      %81 = arith.mulf %80, %79 : vector<128x128xf32>
      %82 = arith.addf %arg9, %81 : vector<128x128xf32>
      scf.yield %82 : vector<128x128xf32>
    }
    %c16_i32_12 = arith.constant 16 : i32
    %c0_13 = arith.constant 0 : index
    %c0_14 = arith.constant 0 : index
    %13 = vector.load %arg7[%c0_13, %c0_14] : memref<128x128xf32, #tpu.memory_space<vmem>>, vector<128x128xf32>
    tpu.vector_store %arg7[%c0_13, %c0_14], %12 {strides = array<i32>} : memref<128x128xf32, #tpu.memory_space<vmem>>, vector<128x128xf32>,
    return
  }
  func.func @transform_0(%arg0: i32, %arg1: memref<2xf32, #tpu.memory_space<smem>>) -> (i32, i32) {
    %c0_i32 = arith.constant 0 : i32
    %c0_i32_0 = arith.constant 0 : i32
    return %arg0, %c0_i32 : i32, i32
  }
  func.func @transform_1(%arg0: i32, %arg1: memref<2xf32, #tpu.memory_space<smem>>) -> (i32, i32) {
    %c0_i32 = arith.constant 0 : i32
    %c0_i32_0 = arith.constant 0 : i32
    %c0_i32_1 = arith.constant 0 : i32
    return %c0_i32, %c0_i32_0 : i32, i32
  }
  func.func @transform_2(%arg0: i32, %arg1: memref<2xf32, #tpu.memory_space<smem>>) -> (i32, i32) {
    %c0_i32 = arith.constant 0 : i32
    %c0_i32_0 = arith.constant 0 : i32
    %c0_i32_1 = arith.constant 0 : i32
    return %c0_i32, %c0_i32_0 : i32, i32
  }
  func.func @transform_3(%arg0: i32, %arg1: memref<2xf32, #tpu.memory_space<smem>>) -> (i32, i32) {
    %c0_i32 = arith.constant 0 : i32
    %c0_i32_0 = arith.constant 0 : i32
    %c0_i32_1 = arith.constant 0 : i32
    return %c0_i32, %c0_i32_0 : i32, i32
  }
  func.func @transform_4(%arg0: i32, %arg1: memref<2xf32, #tpu.memory_space<smem>>) -> (i32, i32) {
    %c0_i32 = arith.constant 0 : i32
    %c0_i32_0 = arith.constant 0 : i32
    %c0_i32_1 = arith.constant 0 : i32
    return %c0_i32, %c0_i32_0 : i32, i32
  }
  func.func @transform_5(%arg0: i32, %arg1: memref<2xf32, #tpu.memory_space<smem>>) -> (i32, i32) {
    %c0_i32 = arith.constant 0 : i32
    %c0_i32_0 = arith.constant 0 : i32
    return %arg0, %c0_i32 : i32, i32
  }
}

</mosaic_0001>

<bundles_post_ra>
// kernel: tpu_custom_call.1
= control target key start
LH: loop header
LB: loop body
LE: loop exit
PB: predicated region body
PF: predicated region fallthrough
CT: control target
= control target key end

     0   :  { %s2267_s24 = smov [#allocation3]   ;;  %s3271_s0 = inlined_call_operand.hbm [shape: f32[2], index: 0, kind: input, shape index: {}]   ;;  %s3272_s1 = inlined_call_operand.hbm [shape: f32[256,128], index: 1, kind: input, shape index: {}]   ;;  %s3273_s2 = inlined_call_operand.hbm [shape: bf16[128,128], index: 2, kind: input, shape index: {}]   ;;  %s3274_s3 = inlined_call_operand.vmem [shape: f32[1,128], index: 3, kind: input, shape index: {}]   ;;  %s3275_s4 = inlined_call_operand.hbm [shape: bf16[128,128], index: 4, kind: input, shape index: {}]   ;;  %s3276_s5 = inlined_call_operand.vmem [shape: f32[1,128], index: 5, kind: input, shape index: {}]   ;;  %s3277_s6 = inlined_call_operand.hbm [shape: f32[256,128], index: 6, kind: output, shape index: {}]  }
   0x1   :  { %s12_s23 = sshll.u32 %s3271_s0, 4  ;;  %s13_s23 = int_to_ptr.hbm [resolvable:$true] %s12_s23 }
   0x2   :  { %15 = dma.hbm_to_smem %s13_s23, 16, %s2267_s24, [#allocation2] }
   0x3   :  { %2169 = dma.done.wait [#allocation2], 16 }
   0x4   :  { %2170 = vsyncadd [#allocation2], 4294967280 }
   0x5   :  { %18 = sfence }
   0x6   :  { %19 = vsyncpa [#allocation5], 0 }
   0x7   :  { %21 = vsyncpa [#allocation5 + $0x1], 0 }
   0x8   :  { %22 = vsyncpa [#allocation8], 0 }
   0x9   :  { %23 = vsyncpa [#allocation6], 0 }
   0xa   :  { %25 = vsyncpa [#allocation6 + $0x1], 0  ;;  %s2316_s25 = smov 0   ;;  %s2318_s26 = smov 0  }
   0xb   :  { %s2320_s27 = smov 0   ;;  %s2322_s28 = smov 0  }
   0xc LB: > { %s2337_s0 = sadd.s32 4294967295, %s2197_s28   ;;  %s1506_s29 = sadd.s32 4294967294, %s2197_s28   ;;  %s2197_s28 = sphi %s2322_s28, %s3393_s28   ;;  %s2193_s27 = sphi %s2320_s27, %s3392_s27   ;;  %s2189_s26 = sphi %s2318_s26, %s3391_s26   ;;  %s2185_s25 = sphi %s2316_s25, %s3390_s25  }
   0xd   : > { %p51_p0 = scmp.ne.s32.totalorder %s2189_s26, %s2185_s25  ;;  %p52_p1 = scmp.eq.s32.totalorder %s2337_s0, 0 }
   0xe   : > { %p159_p2 = scmp.eq.s32.totalorder %s2337_s0, 1  ;;  %p165_p3 = scmp.eq.s32.totalorder %s1506_s29, 1 }
   0xf   : > { %p2346_p4 = por %p52_p1, %p51_p0  ;;  %p1507_p5 = scmp.ge.s32.totalorder %s2197_s28, 1 }
  0x10   : > { %p2351_p6 = por %p165_p3, %p51_p0  ;;  %p172_p7 = scmp.lt.s32.totalorder %s2197_s28, 3 }
  0x11   : > { %s183_s10 = sshll.u32 %s3273_s2, 4  ;;  %s2268_s12 = smov [#allocation7]   ;;  %s184_s10 = int_to_ptr.hbm [resolvable:$true] %s183_s10 }
  0x12   : > { %p2359_p8 = pnand %p1507_p5, %p172_p7  ;;  %s185_s13 = sshll.u32 %s2268_s12, 4  ;;  %s186_s13 = int_to_ptr.vmem [resolvable:$true] %s185_s13 }
  0x13   : > { %s200_s16 = sshll.u32 %s3275_s4, 4  ;;  %s2269_s17 = smov 64   ;;  %s201_s16 = int_to_ptr.hbm [resolvable:$true] %s200_s16 }
  0x14   : > { %p1623_p9 = pneg %p2359_p8  ;;  %s2270_s18 = smov 4  }
  0x15   : > { %s2271_s19 = smov [#allocation9]   ;;  %s2372_s21 = sadd.s32 1, %s2197_s28  }
  0x16   : > { %p1624_p10 = pnand %p1623_p9, %p52_p1  ;;  %s202_s20 = sshll.u32 %s2271_s19, 4  ;;  %s203_s20 = int_to_ptr.vmem [resolvable:$true] %s202_s20 }
  0x17   : > { %s38_s22 = sadd.s32 1, %s2193_s27  ;;  %s35_s23 = ssub.s32 %s2197_s28, %s2372_s21 }
  0x18   : > { %1626 = dma.hbm_to_vmem [thread:$0]  (!%p1624_p10), %s184_s10, 1024, %s186_s13, [#allocation8], %s2269_s17, %s2269_s17, %s2270_s18  }
  0x19   : > { %1629 = dma.hbm_to_vmem [thread:$0]  (!%p1624_p10), %s201_s16, 1024, %s203_s20, [#allocation8], %s2269_s17, %s2269_s17, %s2270_s18  }
  0x1a   : > { %p45_p12 = scmp.ne.s32.totalorder %s2193_s27, %s2189_s26  ;;  %p36_p13 = scmp.eq.s32.totalorder %s35_s23, 0 }
  0x1b   : > { %p46_p0 = scmp.eq.s32.totalorder %s2197_s28, 0  ;;  %p1640_p5 = scmp.lt.s32.totalorder %s2197_s28, 2 }
  0x1c   : > { %p2382_p3 = por %p159_p2, %p45_p12  ;;  %s219_s8 = sand.u32 1, %s2193_s27  }
  0x1d   : > { %s2388_s29 = scalar_select %p36_p13, %s2193_s27, %s38_s22  }
  0x1e   : > { %p47_p7 = por %p46_p0, %p45_p12  ;;  %s1511_s9 = sshll.u32 %s219_s8, 7 }
  0x1f   : > { %s1589_s10 = sshll.u32 %s2197_s28, 7  ;;  %s223_s15 = scalar_lea.vmem [#allocation4], %s1511_s9 }
  0x20   : > { %s228_s14 = scalar_lea.hbm %s3272_s1, %s1589_s10  ;;  %s231_s16 = sshll.u32 %s223_s15, 4  ;;  %s232_s16 = int_to_ptr.vmem [resolvable:$true] %s231_s16 }
  0x21   : > { %s229_s17 = sshll.u32 %s228_s14, 4  ;;  %p2395_p2 = pnand %p1640_p5, %p47_p7  ;;  %s230_s17 = int_to_ptr.hbm [resolvable:$true] %s229_s17 }
  0x22   : > { %s220_s19 = scalar_lea.sflag [#allocation5], %s219_s8  ;;  %s2027_s20 = sshra.s32 %s230_s17, 4  ;;  %s2028_s20 = int_to_ptr.hbm [resolvable:$true] %s2027_s20 }
  0x23   : > { %s2029_s22 = scalar_lea.hbm %s2028_s20, 128  ;;  %p2031_p10 = pneg %p2395_p2 }
  0x24   : > { %p2030_p9 = scmp.ne.s32.totalorder %s2028_s20, %s2029_s22  ;;  %s2034_s10 = scalar_lea.hbm %s3272_s1, 256 }
  0x25   : > { %p2035_p0 = scmp.lt.s32.totalorder %s2028_s20, %s3272_s1  ;;  %p2036_p5 = scmp.lt.s32.totalorder %s2034_s10, %s2029_s22 }
  0x26   : > { %p2032_p12 = pnand %p2031_p10, %p2030_p9 }
  0x27   : > { %p2037_p7 = por %p2036_p5, %p2035_p0 }
  0x28   : > { %p2033_p13 = pneg %p2032_p12 }
  0x2a   : > { %p2038_p11 = pnand %p2037_p7, %p2033_p13 }
  0x2c   : > { %2041 = shalt.err (!%p2038_p11)
}
  0x2d   : > { %s2272_s8 = smov 128   ;;  %s2273_s14 = smov 8  }
  0x2e   : > { %1633 = dma.hbm_to_vmem [thread:$0]  (!%p2395_p2), %s230_s17, 2048, %s232_s16, %s220_s19, %s2272_s8, %s2272_s8, %s2273_s14  }
  0x2f   : > { %243 = sbr.rel (%p2359_p8) target bundleno = 1482 (0x5ca), region = 40 }
  0x34   : > { %s2412_s15 = sand.u32 1, %s2189_s26  }
  0x35   : > { %s1515_s20 = sshll.u32 %s2412_s15, 7  ;;  %s246_s22 = scalar_lea.sflag [#allocation5], %s2412_s15 }
  0x36   : > { %s2418_s23 = scalar_lea.vmem [#allocation4], %s1515_s20 }
  0x37   : > { %2172 = dma.done.wait (%p2346_p4), %s246_s22, 2048  }
  0x38   : > { %2174 = vsyncadd (%p2346_p4), %s246_s22, 4294965248 }
  0x39   : > { %2176 = dma.done.wait (%p52_p1), [#allocation8], 2048  }
  0x3a   : > { %2178 = vsyncadd (%p52_p1), [#allocation8], 4294965248  ;;  %v2274_v0 = vmov 16.0   ;;  %v2275_v1 = vmov 6.0   ;;  %v2428_v3 = vld [vmem:[#allocation7] sm:$0xf] }
  0x3b   : > { %1823 = vrcp.f32 %v2274_v0  ;;  %3288 = vst [vmem:[#allocation15_spill] sm:$0xff] %v2428_v3  ;;  %v2430_v4 = vld [vmem:[#allocation7] sm:$0xf0]  ;;  %v2432_v5 = vld [vmem:[#allocation7 + $0x8] sm:$0xf]  ;;  %v2453_v18 = vld [vmem:[%s2418_s23 + $0x10] sm:$0xff]  }
  0x3c   : > { %1825 = vrcp.f32 %v2275_v1  ;;  %3289 = vst [vmem:[#allocation16_spill] sm:$0xff] %v2430_v4  ;;  %v2434_v8 = vld [vmem:[#allocation7 + $0x8] sm:$0xf0]  ;;  %v2436_v9 = vld [vmem:[#allocation7 + $0x10] sm:$0xf]  ;;  %v2439_v10 = vld [vmem:[%s2418_s23] sm:$0xff]  }
  0x3d   : > { %3290 = vst [vmem:[#allocation17_spill] sm:$0xff] %v2432_v5  ;;  %v2441_v12 = vld [vmem:[#allocation7 + $0x10] sm:$0xf0]  ;;  %v2443_v13 = vld [vmem:[#allocation7 + $0x18] sm:$0xf]  ;;  %v2446_v14 = vld [vmem:[%s2418_s23 + $0x8] sm:$0xff]  }
  0x3e   : > { %3291 = vst [vmem:[#allocation18_spill] sm:$0xff] %v2434_v8  ;;  %v2448_v16 = vld [vmem:[#allocation7 + $0x18] sm:$0xf0]  ;;  %v2450_v17 = vld [vmem:[#allocation7 + $0x20] sm:$0xf]  ;;  %v350_v53 = vld [vmem:[%s2418_s23 + $0x28] sm:$0xff]  }
  0x3f   : > { %3292 = vst [vmem:[#allocation19_spill] sm:$0xff] %v2436_v9  ;;  %v2455_v20 = vld [vmem:[#allocation7 + $0x20] sm:$0xf0]  ;;  %v2457_v21 = vld [vmem:[#allocation7 + $0x28] sm:$0xf]  ;;  %v2460_v22 = vld [vmem:[%s2418_s23 + $0x18] sm:$0xff]  }
  0x40   : > { %3293 = vst [vmem:[#allocation20_spill] sm:$0xff] %v2441_v12  ;;  %v2462_v24 = vld [vmem:[#allocation7 + $0x28] sm:$0xf0]  ;;  %v2464_v25 = vld [vmem:[#allocation7 + $0x30] sm:$0xf]  ;;  %v349_v52 = vld [vmem:[%s2418_s23 + $0x20] sm:$0xff]  }
  0x41   : > { %v1824_v2 = vpop.eup %1823  ;;  %3294 = vst [vmem:[#allocation21_spill] sm:$0xff] %v2443_v13  ;;  %v2466_v26 = vld [vmem:[#allocation7 + $0x30] sm:$0xf0]  ;;  %v2468_v28 = vld [vmem:[#allocation7 + $0x38] sm:$0xf]  ;;  %v353_v56 = vld [vmem:[%s2418_s23 + $0x40] sm:$0xff]  }
  0x42   : > { %v1826_v6 = vpop.eup %1825  ;;  %v293_v7 = vmul.f32 16.0, %v1824_v2  ;;  %3295 = vst [vmem:[#allocation22_spill] sm:$0xff] %v2448_v16  ;;  %vm297_vm0 = vweird.f32 %v1824_v2  ;;  %v2470_v29 = vld [vmem:[#allocation7 + $0x38] sm:$0xf0]  ;;  %v2472_v30 = vld [vmem:[#allocation9] sm:$0xf] }
  0x43   : > { %v303_v11 = vmul.f32 6.0, %v1826_v6  ;;  %3296 = vst [vmem:[#allocation23_spill] sm:$0xff] %v2450_v17  ;;  %vm307_vm1 = vweird.f32 %v1826_v6  ;;  %v2474_v32 = vld [vmem:[#allocation9] sm:$0xf0]  ;;  %v2476_v33 = vld [vmem:[#allocation9 + $0x8] sm:$0xf] }
  0x44   : > { %v294_v15 = vsub.f32 1.0, %v293_v7  ;;  %3297 = vst [vmem:[#allocation24_spill] sm:$0xff] %v2455_v20  ;;  %v2478_v34 = vld [vmem:[#allocation9 + $0x8] sm:$0xf0]  ;;  %v2480_v36 = vld [vmem:[#allocation9 + $0x10] sm:$0xf] }
  0x45   : > { %v304_v19 = vsub.f32 1.0, %v303_v11  ;;  %3298 = vst [vmem:[#allocation25_spill] sm:$0xff] %v2457_v21  ;;  %v2482_v37 = vld [vmem:[#allocation9 + $0x10] sm:$0xf0]  ;;  %v2484_v38 = vld [vmem:[#allocation9 + $0x18] sm:$0xf] }
  0x46   : > { %v295_v23 = vmul.f32 %v1824_v2, %v294_v15  ;;  %3299 = vst [vmem:[#allocation26_spill] sm:$0xff] %v2462_v24  ;;  %v2486_v40 = vld [vmem:[#allocation9 + $0x18] sm:$0xf0]  ;;  %v2488_v41 = vld [vmem:[#allocation9 + $0x20] sm:$0xf]  ;;  %v351_v54 = vld [vmem:[%s2418_s23 + $0x30] sm:$0xff]  }
  0x47   : > { %3300 = vst [vmem:[#allocation27_spill] sm:$0xff] %v2464_v25  ;;  %v305_v27 = vmul.f32 %v1826_v6, %v304_v19  ;;  %v2490_v42 = vld [vmem:[#allocation9 + $0x20] sm:$0xf0]  ;;  %v2492_v44 = vld [vmem:[#allocation9 + $0x28] sm:$0xf]  ;;  %v352_v55 = vld [vmem:[%s2418_s23 + $0x38] sm:$0xff]  }
  0x48   : > { %3301 = vst [vmem:[#allocation28_spill] sm:$0xff] %v2466_v26  ;;  %v296_v31 = vadd.f32 %v1824_v2, %v295_v23  ;;  %v2494_v45 = vld [vmem:[#allocation9 + $0x28] sm:$0xf0]  ;;  %v2496_v46 = vld [vmem:[#allocation9 + $0x30] sm:$0xf]  ;;  %v356_v59 = vld [vmem:[%s2418_s23 + $0x58] sm:$0xff]  }
  0x49   : > { %3302 = vst [vmem:[#allocation29_spill] sm:$0xff] %v2468_v28  ;;  %v306_v35 = vadd.f32 %v1826_v6, %v305_v27  ;;  %v2498_v47 = vld [vmem:[#allocation9 + $0x30] sm:$0xf0]  ;;  %v2500_v48 = vld [vmem:[#allocation9 + $0x38] sm:$0xf]  ;;  %v354_v57 = vld [vmem:[%s2418_s23 + $0x48] sm:$0xff]  }
  0x4a   : > { %3303 = vst [vmem:[#allocation30_spill] sm:$0xff] %v2470_v29  ;;  %v298_v39 = vsel %vm297_vm0, %v1824_v2, %v296_v31  ;;  %v2502_v49 = vld [vmem:[#allocation9 + $0x38] sm:$0xf0]  ;;  %v2507_v50 = vld [vmem:[%s3274_s3] sm:$0x1]  ;;  %v355_v58 = vld [vmem:[%s2418_s23 + $0x50] sm:$0xff]  }
  0x4b   : > { %3304 = vst [vmem:[#allocation31_spill] sm:$0xff] %v2472_v30  ;;  %v308_v43 = vsel %vm307_vm1, %v1826_v6, %v306_v35  ;;  %v2512_v51 = vld [vmem:[%s3276_s5] sm:$0x1]  ;;  %v358_v61 = vld [vmem:[%s2418_s23 + $0x68] sm:$0xff]   ;;  %v359_v62 = vld [vmem:[%s2418_s23 + $0x70] sm:$0xff]   ;;  %s2526_s18 = sld [smem:[#allocation3]] }
  0x4c   : > { %3305 = vst [vmem:[#allocation32_spill] sm:$0xff] %v2474_v32  ;;  %v357_v60 = vld [vmem:[%s2418_s23 + $0x60] sm:$0xff]   ;;  %v360_v63 = vld [vmem:[%s2418_s23 + $0x78] sm:$0xff]   ;;  %s1519_s19 = sld [smem:[#allocation3 + $0x1]]  ;;  %s2538_s22 = scalar_lea.vmem [#allocation10], %s1515_s20 }
  0x4d   : > { %3306 = vst [vmem:[#allocation33_spill] sm:$0xff] %v2476_v33  ;;  %s2576_s20 = smov 0  }
  0x4e   : > { %3307 = vst [vmem:[#allocation34_spill] sm:$0xff] %v2478_v34 }
  0x4f   : > { %3308 = vst [vmem:[#allocation35_spill] sm:$0xff] %v2480_v36 }
  0x50   : > { %3309 = vst [vmem:[#allocation36_spill] sm:$0xff] %v2482_v37 }
  0x51   : > { %3310 = vst [vmem:[#allocation37_spill] sm:$0xff] %v2484_v38 }
  0x52   : > { %3311 = vst [vmem:[#allocation38_spill] sm:$0xff] %v2486_v40  ;;  %s291_s9 = ssub.f32 %s1519_s19, %s2526_s18 }
  0x53   : > { %3312 = vst [vmem:[#allocation39_spill] sm:$0xff] %v2488_v41 }
  0x54   : > { %3313 = vst [vmem:[#allocation40_spill] sm:$0xff] %v2490_v42 }
  0x55   : > { %1607 = vpush %v298_v39 }
  0x56   : > { %3314 = vst [vmem:[#allocation41_spill] sm:$0xff] %v2492_v44 }
  0x57   : > { %3315 = vst [vmem:[#allocation42_spill] sm:$0xff] %v2494_v45 }
  0x58   : > { %3316 = vst [vmem:[#allocation43_spill] sm:$0xff] %v2496_v46 }
  0x59   : > { %1609 = vpush %v308_v43 }
  0x5a   : > { %3317 = vst [vmem:[#allocation44_spill] sm:$0xff] %v2498_v47 }
  0x5b   : > { %3318 = vst [vmem:[#allocation45_spill] sm:$0xff] %v2500_v48 }
  0x5c   : > { %3319 = vst [vmem:[#allocation46_spill] sm:$0xff] %v2502_v49 }
  0x5d   : > { %3320 = vst [vmem:[#allocation47_spill] sm:$0xff] %v2507_v50 }
  0x5e   : > { %3321 = vst [vmem:[#allocation48_spill] sm:$0xff] %v2512_v51 }
  0x86   : > { %s1608_s10 = spop %1607 }
  0x87   : > { %s2529_s12 = smul.f32 %s1608_s10, %s291_s9 }
  0x89   : > { %s301_s8 = smul.f32 0.5, %s2529_s12 }
  0x8a   : > { %s2531_s13 = spop %1609 }
  0x8b   : > { %s310_s14 = smul.f32 %s2531_s13, %s2529_s12 }
  0x8c LB: >> { %v3322_v50 = vld [vmem:[#allocation47_spill] sm:$0xff]  ;;  %3323 = vst [vmem:[#allocation49_spill] sm:$0xff] %v2201_v63  ;;  %v3324_v28 = vld [vmem:[#allocation29_spill] sm:$0xff]  ;;  %v3325_v29 = vld [vmem:[#allocation30_spill] sm:$0xff]  ;;  %v386_v23 = vpack.c.bf16 %v2257_v14, %v2261_v10  ;;  %v387_v27 = vpack.c.bf16 %v2249_v22, %v2253_v18  ;;  %v388_v31 = vpack.c.bf16 %v2241_v53, %v2245_v52  ;;  %v389_v35 = vpack.c.bf16 %v2233_v55, %v2237_v54  ;;  %s383_s23 = scvt.s32.f32 %s2265_s20  ;;  %s366_s20 = sadd.s32 1, %s2265_s20   ;;  %v2201_v63 = vphi %v360_v63, %v3373_v63   ;;  %s2265_s20 = sphi %s2576_s20, %s366_s20   ;;  %v2261_v10 = vphi %v2439_v10, %v3388_v10   ;;  %v2257_v14 = vphi %v2446_v14, %v3387_v14   ;;  %v2253_v18 = vphi %v2453_v18, %v3386_v18   ;;  %v2249_v22 = vphi %v2460_v22, %v3385_v22   ;;  %v2245_v52 = vphi %v349_v52, %v3384_v52   ;;  %v2241_v53 = vphi %v350_v53, %v3383_v53   ;;  %v2237_v54 = vphi %v351_v54, %v3382_v54   ;;  %v2233_v55 = vphi %v352_v55, %v3381_v55   ;;  %v2229_v56 = vphi %v353_v56, %v3380_v56   ;;  %v2225_v57 = vphi %v354_v57, %v3379_v57   ;;  %v2221_v58 = vphi %v355_v58, %v3378_v58   ;;  %v2217_v59 = vphi %v356_v59, %v3377_v59   ;;  %v2213_v60 = vphi %v357_v60, %v3376_v60   ;;  %v2209_v61 = vphi %v358_v61, %v3375_v61   ;;  %v2205_v62 = vphi %v359_v62, %v3374_v62  }
  0x8d   : >> { %v1551_v0 = vor.u32 %v3325_v29, %v3324_v28  ;;  %v3326_v25 = vld [vmem:[#allocation27_spill] sm:$0xff]  ;;  %v3327_v26 = vld [vmem:[#allocation28_spill] sm:$0xff]  ;;  %v3328_v21 = vld [vmem:[#allocation25_spill] sm:$0xff]  ;;  %v390_v39 = vpack.c.bf16 %v2225_v57, %v2229_v56  ;;  %v391_v43 = vpack.c.bf16 %v2217_v59, %v2221_v58  ;;  %p3163_p1 = scmp.ge.s32.totalorder %s366_s20, 16  }
  0x8e   : >> { %v1547_v1 = vor.u32 %v3327_v26, %v3326_v25  ;;  %v3329_v24 = vld [vmem:[#allocation26_spill] sm:$0xff]  ;;  %v3330_v17 = vld [vmem:[#allocation23_spill] sm:$0xff]  ;;  %v3331_v20 = vld [vmem:[#allocation24_spill] sm:$0xff]  ;;  %s384_s30 = smul.f32 %s383_s23, %s2529_s12 }
  0x8f   : >> { %447 = vmatpush.bf16.msra.mxu0 %v1551_v0  ;;  %691 = vmatpush.bf16.msra.mxu2 %v1551_v0  ;;  %v1543_v2 = vor.u32 %v3329_v24, %v3328_v21  ;;  %v1539_v6 = vor.u32 %v3331_v20, %v3330_v17  ;;  %v3332_v13 = vld [vmem:[#allocation21_spill] sm:$0xff]  ;;  %v3333_v16 = vld [vmem:[#allocation22_spill] sm:$0xff]  ;;  %v3334_v9 = vld [vmem:[#allocation19_spill] sm:$0xff] }
  0x90   : >> { %v1535_v7 = vor.u32 %v3333_v16, %v3332_v13  ;;  %v3335_v12 = vld [vmem:[#allocation20_spill] sm:$0xff]  ;;  %v3336_v5 = vld [vmem:[#allocation17_spill] sm:$0xff]  ;;  %v3337_v8 = vld [vmem:[#allocation18_spill] sm:$0xff]  ;;  %s2680_s11 = sadd.f32 %s384_s30, %s2526_s18  ;;  %s1606_s18 = sshll.u32 (%p3163_p1), %s2337_s0, 7 }
  0x91   : >> { %v1531_v11 = vor.u32 %v3335_v12, %v3334_v9  ;;  %v1527_v15 = vor.u32 %v3337_v8, %v3336_v5  ;;  %v3338_v3 = vld [vmem:[#allocation15_spill] sm:$0xff]  ;;  %v3339_v4 = vld [vmem:[#allocation16_spill] sm:$0xff]  ;;  %v3340_v48 = vld [vmem:[#allocation45_spill] sm:$0xff]  ;;  %s1358_s0 = sshll.u32 (%p3163_p1), %s2538_s22, 4  ;;  %s1359_s0 = int_to_ptr.vmem [resolvable:$true] %s1358_s0 }
  0x92   : >> { %v1523_v19 = vor.u32 %v3339_v4, %v3338_v3  ;;  %v3341_v49 = vld [vmem:[#allocation46_spill] sm:$0xff]  ;;  %v3342_v46 = vld [vmem:[#allocation43_spill] sm:$0xff]  ;;  %v3343_v47 = vld [vmem:[#allocation44_spill] sm:$0xff]  ;;  %s644_s16 = sadd.f32 %s2680_s11, %s301_s8 }
  0x93   : >> { %448 = vmatpush.bf16.msra.mxu0 %v1547_v1  ;;  %692 = vmatpush.bf16.msra.mxu2 %v1547_v1  ;;  %v3344_v44 = vld [vmem:[#allocation41_spill] sm:$0xff]  ;;  %v3345_v45 = vld [vmem:[#allocation42_spill] sm:$0xff]  ;;  %v3346_v41 = vld [vmem:[#allocation39_spill] sm:$0xff]  ;;  %s1023_s17 = sadd.f32 %s2680_s11, %s2529_s12 }
  0x94   : >> { %v3347_v42 = vld [vmem:[#allocation40_spill] sm:$0xff]  ;;  %v3348_v38 = vld [vmem:[#allocation37_spill] sm:$0xff]  ;;  %v3349_v40 = vld [vmem:[#allocation38_spill] sm:$0xff] }
  0x95   : >> { %v3350_v36 = vld [vmem:[#allocation35_spill] sm:$0xff]  ;;  %v3351_v37 = vld [vmem:[#allocation36_spill] sm:$0xff]  ;;  %v3352_v33 = vld [vmem:[#allocation33_spill] sm:$0xff] }
  0x96   : >> { %v3353_v34 = vld [vmem:[#allocation34_spill] sm:$0xff]  ;;  %v3354_v30 = vld [vmem:[#allocation31_spill] sm:$0xff]  ;;  %v3355_v32 = vld [vmem:[#allocation32_spill] sm:$0xff] }
  0x97   : >> { %449 = vmatpush.bf16.msra.mxu0 %v1543_v2  ;;  %693 = vmatpush.bf16.msra.mxu2 %v1543_v2  ;;  %v3356_v51 = vld [vmem:[#allocation48_spill] sm:$0xff] }
  0x9b   : >> { %450 = vmatpush.bf16.msra.mxu0 %v1539_v6  ;;  %694 = vmatpush.bf16.msra.mxu2 %v1539_v6 }
  0x9f   : >> { %451 = vmatpush.bf16.msra.mxu0 %v1535_v7  ;;  %695 = vmatpush.bf16.msra.mxu2 %v1535_v7 }
  0xa3   : >> { %452 = vmatpush.bf16.msra.mxu0 %v1531_v11  ;;  %696 = vmatpush.bf16.msra.mxu2 %v1531_v11 }
  0xa7   : >> { %453 = vmatpush.bf16.msra.mxu0 %v1527_v15  ;;  %697 = vmatpush.bf16.msra.mxu2 %v1527_v15 }
  0xab   : >> { %454 = vmatpush.bf16.msra.mxu0 %v1523_v19  ;;  %698 = vmatpush.bf16.msra.mxu2 %v1523_v19 }
  0xae   : >> { %455 = vmatmul.bf16.vlgmr.msra.gmra.mxu0 %v386_v23  ;;  %v1559_v23 = vor.u32 %v3353_v34, %v3352_v33 }
  0xaf   : >> { %877 = vmatpush.bf16.msrb.mxu0 %v1551_v0  ;;  %1070 = vmatpush.bf16.msrb.mxu2 %v1551_v0  ;;  %v1583_v0 = vor.u32 %v3341_v49, %v3340_v48 }
  0xb1   : >> { %595 = vmatpush.bf16.msra.mxu1 %v1583_v0  ;;  %788 = vmatpush.bf16.msra.mxu3 %v1583_v0 }
  0xb3   : >> { %878 = vmatpush.bf16.msrb.mxu0 %v1547_v1  ;;  %1071 = vmatpush.bf16.msrb.mxu2 %v1547_v1  ;;  %v1579_v1 = vor.u32 %v3343_v47, %v3342_v46 }
  0xb5   : >> { %596 = vmatpush.bf16.msra.mxu1 %v1579_v1  ;;  %789 = vmatpush.bf16.msra.mxu3 %v1579_v1 }
  0xb7   : >> { %879 = vmatpush.bf16.msrb.mxu0 %v1543_v2  ;;  %1072 = vmatpush.bf16.msrb.mxu2 %v1543_v2  ;;  %v392_v2 = vpack.c.bf16 %v2209_v61, %v2213_v60 }
  0xbb   : >> { %880 = vmatpush.bf16.msrb.mxu0 %v1539_v6  ;;  %1073 = vmatpush.bf16.msrb.mxu2 %v1539_v6  ;;  %v1575_v6 = vor.u32 %v3345_v45, %v3344_v44 }
  0xbd   : >> { %597 = vmatpush.bf16.msra.mxu1 %v1575_v6  ;;  %790 = vmatpush.bf16.msra.mxu3 %v1575_v6 }
  0xbe   : >> { %460 = vmatmul.bf16.gmra.mxu0 %v387_v27  ;;  %v1555_v27 = vor.u32 %v3355_v32, %v3354_v30 }
  0xbf   : >> { %881 = vmatpush.bf16.msrb.mxu0 %v1535_v7  ;;  %1074 = vmatpush.bf16.msrb.mxu2 %v1535_v7  ;;  %v1571_v7 = vor.u32 %v3347_v42, %v3346_v41 }
  0xc1   : >> { %598 = vmatpush.bf16.msra.mxu1 %v1571_v7  ;;  %791 = vmatpush.bf16.msra.mxu3 %v1571_v7 }
  0xc3   : >> { %882 = vmatpush.bf16.msrb.mxu0 %v1531_v11  ;;  %1075 = vmatpush.bf16.msrb.mxu2 %v1531_v11  ;;  %v1567_v11 = vor.u32 %v3349_v40, %v3348_v38 }
  0xc5   : >> { %599 = vmatpush.bf16.msra.mxu1 %v1567_v11  ;;  %792 = vmatpush.bf16.msra.mxu3 %v1567_v11 }
  0xc7   : >> { %883 = vmatpush.bf16.msrb.mxu0 %v1527_v15  ;;  %1076 = vmatpush.bf16.msrb.mxu2 %v1527_v15  ;;  %v1563_v15 = vor.u32 %v3351_v37, %v3350_v36 }
  0xc9   : >> { %600 = vmatpush.bf16.msra.mxu1 %v1563_v15  ;;  %793 = vmatpush.bf16.msra.mxu3 %v1563_v15 }
  0xcb   : >> { %884 = vmatpush.bf16.msrb.mxu0 %v1523_v19  ;;  %1077 = vmatpush.bf16.msrb.mxu2 %v1523_v19  ;;  %v393_v19 = vpack.c.bf16 %v2201_v63, %v2205_v62 }
  0xcd   : >> { %601 = vmatpush.bf16.msra.mxu1 %v1559_v23  ;;  %794 = vmatpush.bf16.msra.mxu3 %v1559_v23 }
  0xce   : >> { %465 = vmatmul.bf16.gmra.mxu0 %v388_v31  ;;  %v394_v31 = vstv %s2680_s11  ;;  %s2077_s11 = scalar_lea.hbm (%p3163_p1), %s3277_s6, 256 }
  0xd1   : >> { %602 = vmatpush.bf16.msra.mxu1 %v1555_v27  ;;  %795 = vmatpush.bf16.msra.mxu3 %v1555_v27 }
  0xd5   : >> { %974 = vmatpush.bf16.msrb.mxu1 %v1583_v0  ;;  %1167 = vmatpush.bf16.msrb.mxu3 %v1583_v0 }
  0xd9   : >> { %975 = vmatpush.bf16.msrb.mxu1 %v1579_v1  ;;  %1168 = vmatpush.bf16.msrb.mxu3 %v1579_v1 }
  0xdd   : >> { %976 = vmatpush.bf16.msrb.mxu1 %v1575_v6  ;;  %1169 = vmatpush.bf16.msrb.mxu3 %v1575_v6 }
  0xde   : >> { %470 = vmatmul.bf16.gmra.mxu0 %v389_v35 }
  0xe1   : >> { %977 = vmatpush.bf16.msrb.mxu1 %v1571_v7  ;;  %1170 = vmatpush.bf16.msrb.mxu3 %v1571_v7 }
  0xe5   : >> { %978 = vmatpush.bf16.msrb.mxu1 %v1567_v11  ;;  %1171 = vmatpush.bf16.msrb.mxu3 %v1567_v11 }
  0xe9   : >> { %979 = vmatpush.bf16.msrb.mxu1 %v1563_v15  ;;  %1172 = vmatpush.bf16.msrb.mxu3 %v1563_v15 }
  0xed   : >> { %980 = vmatpush.bf16.msrb.mxu1 %v1559_v23  ;;  %1173 = vmatpush.bf16.msrb.mxu3 %v1559_v23 }
  0xee   : >> { %475 = vmatmul.bf16.gmra.mxu0 %v390_v39  ;;  %v395_v39 = vmul.f32 %v394_v31, %v3322_v50 }
  0xf1   : >> { %981 = vmatpush.bf16.msrb.mxu1 %v1555_v27  ;;  %1174 = vmatpush.bf16.msrb.mxu3 %v1555_v27 }
  0xfe   : >> { %480 = vmatmul.bf16.gmra.mxu0 %v391_v43  ;;  %v2684_v43 = vperm.slane %v395_v39, 0 }
 0x10e   : >> { %485 = vmatmul.bf16.gmra.mxu0 %v392_v2 }
 0x11e   : >> { %490 = vmatmul.bf16.gmra.mxu0 %v393_v19 }
 0x12b   : >> { %v456_v35 = vpop.f32.mrf.mxu0 }
 0x12c   : >> { %v457_v0 = vadd.f32 %v456_v35, %v2684_v43 }
 0x133   : >> { %v458_v2 = vpop.f32.mrf.mxu0 }
 0x134   : >> { %v459_v19 = vadd.f32 %v458_v2, %v2684_v43 }
 0x136   : >> { %v496_v3 = vpack.c.bf16 %v459_v19, %v457_v0 }
 0x138   : >> { %v504_v1 = vunpack.c.l.bf16 %v496_v3  ;;  %v505_v4 = vunpack.c.h.bf16 %v496_v3 }
 0x13a   : >> { %1827 = vtanh.f32 %v504_v1 }
 0x13b   : >> { %1829 = vtanh.f32 %v505_v4  ;;  %v461_v6 = vpop.f32.mrf.mxu0 }
 0x13c   : >> { %v462_v35 = vadd.f32 %v461_v6, %v2684_v43 }
 0x140   : >> { %v1828_v7 = vpop.eup %1827 }
 0x141   : >> { %v1830_v31 = vpop.eup %1829 }
 0x142   : >> { %v536_v11 = vpack.c.bf16 %v1830_v31, %v1828_v7 }
 0x143   : >> { %v463_v39 = vpop.f32.mrf.mxu0 }
 0x144   : >> { %v464_v2 = vadd.f32 %v463_v39, %v2684_v43  ;;  %603 = vmatmul.bf16.vlgmr.msra.gmra.mxu1 %v536_v11 }
 0x146   : >> { %v497_v0 = vpack.c.bf16 %v464_v2, %v462_v35 }
 0x148   : >> { %v506_v15 = vunpack.c.l.bf16 %v497_v0  ;;  %v507_v19 = vunpack.c.h.bf16 %v497_v0 }
 0x14a   : >> { %1831 = vtanh.f32 %v506_v15 }
 0x14b   : >> { %1833 = vtanh.f32 %v507_v19  ;;  %v466_v3 = vpop.f32.mrf.mxu0 }
 0x14c   : >> { %v467_v27 = vadd.f32 %v466_v3, %v2684_v43 }
 0x150   : >> { %v1832_v23 = vpop.eup %1831 }
 0x151   : >> { %v1834_v4 = vpop.eup %1833 }
 0x152   : >> { %v537_v1 = vpack.c.bf16 %v1834_v4, %v1832_v23 }
 0x153   : >> { %v468_v5 = vpop.f32.mrf.mxu0 }
 0x154   : >> { %v469_v7 = vadd.f32 %v468_v5, %v2684_v43  ;;  %608 = vmatmul.bf16.gmra.mxu1 %v537_v1 }
 0x156   : >> { %v498_v31 = vpack.c.bf16 %v469_v7, %v467_v27 }
 0x158   : >> { %v508_v6 = vunpack.c.l.bf16 %v498_v31  ;;  %v509_v8 = vunpack.c.h.bf16 %v498_v31 }
 0x15a   : >> { %1835 = vtanh.f32 %v508_v6 }
 0x15b   : >> { %1837 = vtanh.f32 %v509_v8  ;;  %v471_v11 = vpop.f32.mrf.mxu0 }
 0x15c   : >> { %v472_v15 = vadd.f32 %v471_v11, %v2684_v43 }
 0x160   : >> { %v1836_v39 = vpop.eup %1835 }
 0x161   : >> { %v1838_v35 = vpop.eup %1837 }
 0x162   : >> { %v538_v2 = vpack.c.bf16 %v1838_v35, %v1836_v39 }
 0x163   : >> { %v473_v0 = vpop.f32.mrf.mxu0 }
 0x164   : >> { %v474_v19 = vadd.f32 %v473_v0, %v2684_v43  ;;  %613 = vmatmul.bf16.gmra.mxu1 %v538_v2 }
 0x166   : >> { %v499_v23 = vpack.c.bf16 %v474_v19, %v472_v15 }
 0x168   : >> { %v510_v3 = vunpack.c.l.bf16 %v499_v23  ;;  %v511_v4 = vunpack.c.h.bf16 %v499_v23 }
 0x16a   : >> { %1839 = vtanh.f32 %v510_v3 }
 0x16b   : >> { %1841 = vtanh.f32 %v511_v4  ;;  %v476_v5 = vpop.f32.mrf.mxu0 }
 0x16c   : >> { %v477_v31 = vadd.f32 %v476_v5, %v2684_v43 }
 0x170   : >> { %v1840_v1 = vpop.eup %1839 }
 0x171   : >> { %v1842_v27 = vpop.eup %1841 }
 0x172   : >> { %v539_v7 = vpack.c.bf16 %v1842_v27, %v1840_v1 }
 0x173   : >> { %v478_v8 = vpop.f32.mrf.mxu0 }
 0x174   : >> { %v479_v6 = vadd.f32 %v478_v8, %v2684_v43  ;;  %618 = vmatmul.bf16.gmra.mxu1 %v539_v7 }
 0x176   : >> { %v500_v39 = vpack.c.bf16 %v479_v6, %v477_v31 }
 0x178   : >> { %v512_v11 = vunpack.c.l.bf16 %v500_v39  ;;  %v513_v35 = vunpack.c.h.bf16 %v500_v39 }
 0x17a   : >> { %1843 = vtanh.f32 %v512_v11 }
 0x17b   : >> { %1845 = vtanh.f32 %v513_v35  ;;  %v481_v2 = vpop.f32.mrf.mxu0 }
 0x17c   : >> { %v482_v3 = vadd.f32 %v481_v2, %v2684_v43 }
 0x180   : >> { %v1844_v0 = vpop.eup %1843 }
 0x181   : >> { %v1846_v15 = vpop.eup %1845 }
 0x182   : >> { %v540_v19 = vpack.c.bf16 %v1846_v15, %v1844_v0 }
 0x183   : >> { %v483_v23 = vpop.f32.mrf.mxu0 }
 0x184   : >> { %v484_v4 = vadd.f32 %v483_v23, %v2684_v43  ;;  %623 = vmatmul.bf16.gmra.mxu1 %v540_v19 }
 0x186   : >> { %v501_v1 = vpack.c.bf16 %v484_v4, %v482_v3 }
 0x188   : >> { %v514_v5 = vunpack.c.l.bf16 %v501_v1  ;;  %v515_v27 = vunpack.c.h.bf16 %v501_v1 }
 0x18a   : >> { %1847 = vtanh.f32 %v514_v5 }
 0x18b   : >> { %1849 = vtanh.f32 %v515_v27  ;;  %v486_v7 = vpop.f32.mrf.mxu0 }
 0x18c   : >> { %v487_v11 = vadd.f32 %v486_v7, %v2684_v43 }
 0x190   : >> { %v1848_v8 = vpop.eup %1847 }
 0x191   : >> { %v1850_v31 = vpop.eup %1849 }
 0x192   : >> { %v541_v6 = vpack.c.bf16 %v1850_v31, %v1848_v8 }
 0x193   : >> { %v488_v39 = vpop.f32.mrf.mxu0 }
 0x194   : >> { %v489_v35 = vadd.f32 %v488_v39, %v2684_v43  ;;  %628 = vmatmul.bf16.gmra.mxu1 %v541_v6 }
 0x196   : >> { %v502_v0 = vpack.c.bf16 %v489_v35, %v487_v11 }
 0x198   : >> { %v516_v2 = vunpack.c.l.bf16 %v502_v0  ;;  %v517_v15 = vunpack.c.h.bf16 %v502_v0  ;;  %v2703_v0 = vperm.slane %v3356_v51, 0 }
 0x19a   : >> { %1851 = vtanh.f32 %v516_v2 }
 0x19b   : >> { %1853 = vtanh.f32 %v517_v15  ;;  %v491_v19 = vpop.f32.mrf.mxu0  ;;  %v2710_v15 = vstv %s301_s8  ;;  %s1346_s8 = scalar_lea.sflag (%p3163_p1), [#allocation6], %s2412_s15 }
 0x19c   : >> { %v492_v5 = vadd.f32 %v491_v19, %v2684_v43 }
 0x1a0   : >> { %v1852_v23 = vpop.eup %1851 }
 0x1a1   : >> { %v1854_v3 = vpop.eup %1853 }
 0x1a2   : >> { %v542_v4 = vpack.c.bf16 %v1854_v3, %v1852_v23 }
 0x1a3   : >> { %v493_v1 = vpop.f32.mrf.mxu0 }
 0x1a4   : >> { %v494_v27 = vadd.f32 %v493_v1, %v2684_v43  ;;  %633 = vmatmul.bf16.gmra.mxu1 %v542_v4 }
 0x1a6   : >> { %v503_v7 = vpack.c.bf16 %v494_v27, %v492_v5 }
 0x1a8   : >> { %v518_v8 = vunpack.c.l.bf16 %v503_v7  ;;  %v519_v31 = vunpack.c.h.bf16 %v503_v7 }
 0x1aa   : >> { %1855 = vtanh.f32 %v518_v8 }
 0x1ab   : >> { %1857 = vtanh.f32 %v519_v31 }
 0x1b0   : >> { %v1856_v6 = vpop.eup %1855 }
 0x1b1   : >> { %v1858_v39 = vpop.eup %1857 }
 0x1b2   : >> { %v543_v11 = vpack.c.bf16 %v1858_v39, %v1856_v6 }
 0x1b4   : >> { %638 = vmatmul.bf16.gmra.mxu1 %v543_v11 }
 0x1c1   : >> { %v604_v35 = vpop.f32.mrf.mxu1 }
 0x1c2   : >> { %v2706_v2 = vadd.f32 %v604_v35, %v2703_v0 }
 0x1c4   : >> { %v646_v19 = vmul.f32 %v2710_v15, %v2706_v2 }
 0x1c6   : >> { %v662_v4 = vadd.f32 %v2261_v10, %v646_v19 }
 0x1c9   : >> { %v606_v43 = vpop.f32.mrf.mxu1 }
 0x1ca   : >> { %v2715_v23 = vadd.f32 %v606_v43, %v2703_v0 }
 0x1cc   : >> { %v647_v3 = vmul.f32 %v2710_v15, %v2715_v23 }
 0x1ce   : >> { %v663_v1 = vadd.f32 %v2257_v14, %v647_v3 }
 0x1d0   : >> { %v678_v5 = vpack.c.bf16 %v663_v1, %v662_v4 }
 0x1d1   : >> { %v609_v27 = vpop.f32.mrf.mxu1 }
 0x1d2   : >> { %699 = vmatmul.bf16.vlgmr.msra.gmra.mxu2 %v678_v5  ;;  %v2722_v7 = vadd.f32 %v609_v27, %v2703_v0 }
 0x1d4   : >> { %v648_v31 = vmul.f32 %v2710_v15, %v2722_v7 }
 0x1d6   : >> { %v664_v11 = vadd.f32 %v2253_v18, %v648_v31 }
 0x1d9   : >> { %v611_v8 = vpop.f32.mrf.mxu1 }
 0x1da   : >> { %v2727_v6 = vadd.f32 %v611_v8, %v2703_v0 }
 0x1dc   : >> { %v649_v39 = vmul.f32 %v2710_v15, %v2727_v6 }
 0x1de   : >> { %v665_v35 = vadd.f32 %v2249_v22, %v649_v39 }
 0x1e0   : >> { %v679_v43 = vpack.c.bf16 %v665_v35, %v664_v11 }
 0x1e1   : >> { %v614_v19 = vpop.f32.mrf.mxu1 }
 0x1e2   : >> { %704 = vmatmul.bf16.gmra.mxu2 %v679_v43  ;;  %v2734_v3 = vadd.f32 %v614_v19, %v2703_v0 }
 0x1e4   : >> { %v650_v1 = vmul.f32 %v2710_v15, %v2734_v3 }
 0x1e6   : >> { %v666_v8 = vadd.f32 %v2245_v52, %v650_v1 }
 0x1e9   : >> { %v616_v4 = vpop.f32.mrf.mxu1 }
 0x1ea   : >> { %v2739_v5 = vadd.f32 %v616_v4, %v2703_v0 }
 0x1ec   : >> { %v651_v27 = vmul.f32 %v2710_v15, %v2739_v5 }
 0x1ee   : >> { %v667_v31 = vadd.f32 %v2241_v53, %v651_v27 }
 0x1f0   : >> { %v680_v39 = vpack.c.bf16 %v667_v31, %v666_v8 }
 0x1f1   : >> { %v619_v11 = vpop.f32.mrf.mxu1 }
 0x1f2   : >> { %709 = vmatmul.bf16.gmra.mxu2 %v680_v39  ;;  %v2746_v35 = vadd.f32 %v619_v11, %v2703_v0 }
 0x1f4   : >> { %v652_v19 = vmul.f32 %v2710_v15, %v2746_v35 }
 0x1f6   : >> { %v668_v1 = vadd.f32 %v2237_v54, %v652_v19 }
 0x1f9   : >> { %v621_v43 = vpop.f32.mrf.mxu1 }
 0x1fa   : >> { %v2751_v4 = vadd.f32 %v621_v43, %v2703_v0 }
 0x1fc   : >> { %v653_v9 = vmul.f32 %v2710_v15, %v2751_v4 }
 0x1fe   : >> { %v669_v27 = vadd.f32 %v2233_v55, %v653_v9 }
 0x200   : >> { %v681_v8 = vpack.c.bf16 %v669_v27, %v668_v1 }
 0x201   : >> { %v624_v31 = vpop.f32.mrf.mxu1 }
 0x202   : >> { %714 = vmatmul.bf16.gmra.mxu2 %v681_v8  ;;  %v2758_v39 = vadd.f32 %v624_v31, %v2703_v0 }
 0x204   : >> { %v654_v12 = vmul.f32 %v2710_v15, %v2758_v39 }
 0x206   : >> { %v670_v19 = vadd.f32 %v2229_v56, %v654_v12 }
 0x209   : >> { %v626_v11 = vpop.f32.mrf.mxu1 }
 0x20a   : >> { %v2763_v43 = vadd.f32 %v626_v11, %v2703_v0 }
 0x20c   : >> { %v655_v13 = vmul.f32 %v2710_v15, %v2763_v43 }
 0x20e   : >> { %v671_v9 = vadd.f32 %v2225_v57, %v655_v13 }
 0x210   : >> { %v682_v1 = vpack.c.bf16 %v671_v9, %v670_v19 }
 0x211   : >> { %v629_v27 = vpop.f32.mrf.mxu1 }
 0x212   : >> { %719 = vmatmul.bf16.gmra.mxu2 %v682_v1  ;;  %v2770_v8 = vadd.f32 %v629_v27, %v2703_v0 }
 0x214   : >> { %v656_v16 = vmul.f32 %v2710_v15, %v2770_v8 }
 0x216   : >> { %v672_v12 = vadd.f32 %v2221_v58, %v656_v16 }
 0x219   : >> { %v631_v31 = vpop.f32.mrf.mxu1 }
 0x21a   : >> { %v2775_v11 = vadd.f32 %v631_v31, %v2703_v0 }
 0x21c   : >> { %v657_v17 = vmul.f32 %v2710_v15, %v2775_v11 }
 0x21e   : >> { %v673_v13 = vadd.f32 %v2217_v59, %v657_v17 }
 0x220   : >> { %v683_v19 = vpack.c.bf16 %v673_v13, %v672_v12 }
 0x221   : >> { %v634_v9 = vpop.f32.mrf.mxu1 }
 0x222   : >> { %724 = vmatmul.bf16.gmra.mxu2 %v683_v19  ;;  %v2782_v1 = vadd.f32 %v634_v9, %v2703_v0 }
 0x224   : >> { %v658_v20 = vmul.f32 %v2710_v15, %v2782_v1 }
 0x226   : >> { %v674_v17 = vadd.f32 %v2213_v60, %v658_v20 }
 0x229   : >> { %v636_v27 = vpop.f32.mrf.mxu1 }
 0x22a   : >> { %v2787_v31 = vadd.f32 %v636_v27, %v2703_v0 }
 0x22c   : >> { %v659_v16 = vmul.f32 %v2710_v15, %v2787_v31 }
 0x22e   : >> { %v675_v12 = vadd.f32 %v2209_v61, %v659_v16 }
 0x230   : >> { %v684_v13 = vpack.c.bf16 %v675_v12, %v674_v17  ;;  %v686_v12 = vstv %s644_s16 }
 0x231   : >> { %v639_v19 = vpop.f32.mrf.mxu1 }
 0x232   : >> { %729 = vmatmul.bf16.gmra.mxu2 %v684_v13  ;;  %v2794_v9 = vadd.f32 %v639_v19, %v2703_v0  ;;  %v687_v19 = vmul.f32 %v686_v12, %v3322_v50 }
 0x234   : >> { %v660_v27 = vmul.f32 %v2710_v15, %v2794_v9  ;;  %v2809_v26 = vperm.slane %v687_v19, 0 }
 0x236   : >> { %v676_v20 = vadd.f32 %v2205_v62, %v660_v27 }
 0x239   : >> { %v641_v21 = vpop.f32.mrf.mxu1 }
 0x23a   : >> { %v2799_v24 = vadd.f32 %v641_v21, %v2703_v0 }
 0x23c   : >> { %3357 = vst [vmem:[#allocation50_spill] sm:$0xff] %v2799_v24  ;;  %v661_v25 = vmul.f32 %v2710_v15, %v2799_v24 }
 0x23e   : >> { %v677_v16 = vadd.f32 %v2201_v63, %v661_v25 }
 0x240   : >> { %v685_v17 = vpack.c.bf16 %v677_v16, %v676_v20 }
 0x242   : >> { %734 = vmatmul.bf16.gmra.mxu2 %v685_v17 }
 0x255   : >> { %v700_v13 = vpop.f32.mrf.mxu2 }
 0x256   : >> { %v701_v21 = vadd.f32 %v700_v13, %v2809_v26 }
 0x25d   : >> { %v702_v28 = vpop.f32.mrf.mxu2 }
 0x25e   : >> { %v703_v29 = vadd.f32 %v702_v28, %v2809_v26 }
 0x260   : >> { %v740_v30 = vpack.c.bf16 %v703_v29, %v701_v21 }
 0x262   : >> { %v748_v32 = vunpack.c.l.bf16 %v740_v30  ;;  %v749_v27 = vunpack.c.h.bf16 %v740_v30 }
 0x264   : >> { %1859 = vtanh.f32 %v748_v32 }
 0x265   : >> { %1861 = vtanh.f32 %v749_v27  ;;  %v705_v25 = vpop.f32.mrf.mxu2 }
 0x266   : >> { %v706_v34 = vadd.f32 %v705_v25, %v2809_v26 }
 0x26a   : >> { %v1860_v20 = vpop.eup %1859 }
 0x26b   : >> { %v1862_v16 = vpop.eup %1861 }
 0x26c   : >> { %v780_v17 = vpack.c.bf16 %v1862_v16, %v1860_v20 }
 0x26d   : >> { %v707_v33 = vpop.f32.mrf.mxu2 }
 0x26e   : >> { %v708_v12 = vadd.f32 %v707_v33, %v2809_v26  ;;  %796 = vmatmul.bf16.vlgmr.msra.gmra.mxu3 %v780_v17 }
 0x270   : >> { %v741_v19 = vpack.c.bf16 %v708_v12, %v706_v34 }
 0x272   : >> { %v750_v36 = vunpack.c.l.bf16 %v741_v19  ;;  %v751_v13 = vunpack.c.h.bf16 %v741_v19 }
 0x274   : >> { %1863 = vtanh.f32 %v750_v36 }
 0x275   : >> { %1865 = vtanh.f32 %v751_v13  ;;  %v710_v28 = vpop.f32.mrf.mxu2 }
 0x276   : >> { %v711_v27 = vadd.f32 %v710_v28, %v2809_v26 }
 0x27a   : >> { %v1864_v29 = vpop.eup %1863 }
 0x27b   : >> { %v1866_v30 = vpop.eup %1865 }
 0x27c   : >> { %v781_v32 = vpack.c.bf16 %v1866_v30, %v1864_v29 }
 0x27d   : >> { %v712_v21 = vpop.f32.mrf.mxu2 }
 0x27e   : >> { %v713_v20 = vadd.f32 %v712_v21, %v2809_v26  ;;  %801 = vmatmul.bf16.gmra.mxu3 %v781_v32 }
 0x280   : >> { %v742_v16 = vpack.c.bf16 %v713_v20, %v711_v27 }
 0x282   : >> { %v752_v25 = vunpack.c.l.bf16 %v742_v16  ;;  %v753_v37 = vunpack.c.h.bf16 %v742_v16 }
 0x284   : >> { %1867 = vtanh.f32 %v752_v25 }
 0x285   : >> { %1869 = vtanh.f32 %v753_v37  ;;  %v715_v33 = vpop.f32.mrf.mxu2 }
 0x286   : >> { %v716_v19 = vadd.f32 %v715_v33, %v2809_v26 }
 0x28a   : >> { %v1868_v34 = vpop.eup %1867 }
 0x28b   : >> { %v1870_v17 = vpop.eup %1869 }
 0x28c   : >> { %v782_v36 = vpack.c.bf16 %v1870_v17, %v1868_v34 }
 0x28d   : >> { %v717_v12 = vpop.f32.mrf.mxu2 }
 0x28e   : >> { %v718_v13 = vadd.f32 %v717_v12, %v2809_v26  ;;  %806 = vmatmul.bf16.gmra.mxu3 %v782_v36 }
 0x290   : >> { %v743_v29 = vpack.c.bf16 %v718_v13, %v716_v19 }
 0x292   : >> { %v754_v28 = vunpack.c.l.bf16 %v743_v29  ;;  %v755_v30 = vunpack.c.h.bf16 %v743_v29 }
 0x294   : >> { %1871 = vtanh.f32 %v754_v28 }
 0x295   : >> { %1873 = vtanh.f32 %v755_v30  ;;  %v720_v32 = vpop.f32.mrf.mxu2 }
 0x296   : >> { %v721_v16 = vadd.f32 %v720_v32, %v2809_v26 }
 0x29a   : >> { %v1872_v21 = vpop.eup %1871 }
 0x29b   : >> { %v1874_v27 = vpop.eup %1873 }
 0x29c   : >> { %v783_v20 = vpack.c.bf16 %v1874_v27, %v1872_v21 }
 0x29d   : >> { %v722_v37 = vpop.f32.mrf.mxu2 }
 0x29e   : >> { %v723_v25 = vadd.f32 %v722_v37, %v2809_v26  ;;  %811 = vmatmul.bf16.gmra.mxu3 %v783_v20 }
 0x2a0   : >> { %v744_v34 = vpack.c.bf16 %v723_v25, %v721_v16 }
 0x2a2   : >> { %v756_v33 = vunpack.c.l.bf16 %v744_v34  ;;  %v757_v17 = vunpack.c.h.bf16 %v744_v34 }
 0x2a4   : >> { %1875 = vtanh.f32 %v756_v33 }
 0x2a5   : >> { %1877 = vtanh.f32 %v757_v17  ;;  %v725_v36 = vpop.f32.mrf.mxu2 }
 0x2a6   : >> { %v726_v28 = vadd.f32 %v725_v36, %v2809_v26 }
 0x2aa   : >> { %v1876_v12 = vpop.eup %1875 }
 0x2ab   : >> { %v1878_v19 = vpop.eup %1877 }
 0x2ac   : >> { %v784_v13 = vpack.c.bf16 %v1878_v19, %v1876_v12 }
 0x2ad   : >> { %v727_v29 = vpop.f32.mrf.mxu2 }
 0x2ae   : >> { %v728_v30 = vadd.f32 %v727_v29, %v2809_v26  ;;  %816 = vmatmul.bf16.gmra.mxu3 %v784_v13 }
 0x2b0   : >> { %v745_v21 = vpack.c.bf16 %v728_v30, %v726_v28 }
 0x2b2   : >> { %v758_v32 = vunpack.c.l.bf16 %v745_v21  ;;  %v759_v27 = vunpack.c.h.bf16 %v745_v21 }
 0x2b4   : >> { %1879 = vtanh.f32 %v758_v32 }
 0x2b5   : >> { %1881 = vtanh.f32 %v759_v27  ;;  %v730_v20 = vpop.f32.mrf.mxu2 }
 0x2b6   : >> { %v731_v33 = vadd.f32 %v730_v20, %v2809_v26 }
 0x2ba   : >> { %v1880_v37 = vpop.eup %1879 }
 0x2bb   : >> { %v1882_v16 = vpop.eup %1881 }
 0x2bc   : >> { %v785_v25 = vpack.c.bf16 %v1882_v16, %v1880_v37 }
 0x2bd   : >> { %v732_v34 = vpop.f32.mrf.mxu2 }
 0x2be   : >> { %v733_v17 = vadd.f32 %v732_v34, %v2809_v26  ;;  %821 = vmatmul.bf16.gmra.mxu3 %v785_v25 }
 0x2c0   : >> { %v746_v12 = vpack.c.bf16 %v733_v17, %v731_v33 }
 0x2c2   : >> { %v760_v36 = vunpack.c.l.bf16 %v746_v12  ;;  %v761_v19 = vunpack.c.h.bf16 %v746_v12 }
 0x2c4   : >> { %1883 = vtanh.f32 %v760_v36 }
 0x2c5   : >> { %1885 = vtanh.f32 %v761_v19  ;;  %v735_v13 = vpop.f32.mrf.mxu2 }
 0x2c6   : >> { %v736_v32 = vadd.f32 %v735_v13, %v2809_v26 }
 0x2ca   : >> { %v1884_v29 = vpop.eup %1883 }
 0x2cb   : >> { %v1886_v28 = vpop.eup %1885 }
 0x2cc   : >> { %v786_v30 = vpack.c.bf16 %v1886_v28, %v1884_v29 }
 0x2cd   : >> { %v737_v21 = vpop.f32.mrf.mxu2 }
 0x2ce   : >> { %v738_v27 = vadd.f32 %v737_v21, %v2809_v26  ;;  %826 = vmatmul.bf16.gmra.mxu3 %v786_v30 }
 0x2d0   : >> { %v747_v37 = vpack.c.bf16 %v738_v27, %v736_v32 }
 0x2d2   : >> { %v762_v20 = vunpack.c.l.bf16 %v747_v37  ;;  %v763_v16 = vunpack.c.h.bf16 %v747_v37 }
 0x2d4   : >> { %1887 = vtanh.f32 %v762_v20 }
 0x2d5   : >> { %1889 = vtanh.f32 %v763_v16 }
 0x2da   : >> { %v1888_v25 = vpop.eup %1887 }
 0x2db   : >> { %v1890_v34 = vpop.eup %1889 }
 0x2dc   : >> { %v787_v33 = vpack.c.bf16 %v1890_v34, %v1888_v25 }
 0x2de   : >> { %831 = vmatmul.bf16.gmra.mxu3 %v787_v33 }
 0x2f1   : >> { %v797_v17 = vpop.f32.mrf.mxu3 }
 0x2f2   : >> { %v2828_v12 = vadd.f32 %v797_v17, %v2703_v0 }
 0x2f4   : >> { %v837_v19 = vmul.f32 %v2828_v12, %v2710_v15 }
 0x2f6   : >> { %v853_v28 = vadd.f32 %v2261_v10, %v837_v19 }
 0x2f9   : >> { %v799_v36 = vpop.f32.mrf.mxu3 }
 0x2fa   : >> { %v2833_v13 = vadd.f32 %v799_v36, %v2703_v0 }
 0x2fc   : >> { %v838_v29 = vmul.f32 %v2833_v13, %v2710_v15 }
 0x2fe   : >> { %v854_v30 = vadd.f32 %v2257_v14, %v838_v29 }
 0x300   : >> { %v869_v21 = vpack.c.bf16 %v854_v30, %v853_v28 }
 0x301   : >> { %v802_v32 = vpop.f32.mrf.mxu3 }
 0x302   : >> { %885 = vmatmul.bf16.vlgmr.msrb.gmra.mxu0 %v869_v21  ;;  %v2840_v27 = vadd.f32 %v802_v32, %v2703_v0 }
 0x304   : >> { %v839_v20 = vmul.f32 %v2840_v27, %v2710_v15 }
 0x306   : >> { %v855_v34 = vadd.f32 %v2253_v18, %v839_v20 }
 0x309   : >> { %v804_v37 = vpop.f32.mrf.mxu3 }
 0x30a   : >> { %v2845_v16 = vadd.f32 %v804_v37, %v2703_v0 }
 0x30c   : >> { %v840_v25 = vmul.f32 %v2845_v16, %v2710_v15 }
 0x30e   : >> { %v856_v33 = vadd.f32 %v2249_v22, %v840_v25 }
 0x310   : >> { %v870_v17 = vpack.c.bf16 %v856_v33, %v855_v34 }
 0x311   : >> { %v807_v36 = vpop.f32.mrf.mxu3 }
 0x312   : >> { %890 = vmatmul.bf16.gmra.mxu0 %v870_v17  ;;  %v2852_v19 = vadd.f32 %v807_v36, %v2703_v0 }
 0x314   : >> { %v841_v28 = vmul.f32 %v2852_v19, %v2710_v15 }
 0x316   : >> { %v857_v32 = vadd.f32 %v2245_v52, %v841_v28 }
 0x319   : >> { %v809_v29 = vpop.f32.mrf.mxu3 }
 0x31a   : >> { %v2857_v30 = vadd.f32 %v809_v29, %v2703_v0 }
 0x31c   : >> { %v842_v21 = vmul.f32 %v2857_v30, %v2710_v15 }
 0x31e   : >> { %v858_v37 = vadd.f32 %v2241_v53, %v842_v21 }
 0x320   : >> { %v871_v20 = vpack.c.bf16 %v858_v37, %v857_v32 }
 0x321   : >> { %v812_v25 = vpop.f32.mrf.mxu3 }
 0x322   : >> { %895 = vmatmul.bf16.gmra.mxu0 %v871_v20  ;;  %v2864_v34 = vadd.f32 %v812_v25, %v2703_v0 }
 0x324   : >> { %v843_v17 = vmul.f32 %v2864_v34, %v2710_v15 }
 0x326   : >> { %v859_v28 = vadd.f32 %v2237_v54, %v843_v17 }
 0x329   : >> { %v814_v33 = vpop.f32.mrf.mxu3 }
 0x32a   : >> { %v2869_v36 = vadd.f32 %v814_v33, %v2703_v0 }
 0x32c   : >> { %v844_v29 = vmul.f32 %v2869_v36, %v2710_v15 }
 0x32e   : >> { %v860_v21 = vadd.f32 %v2233_v55, %v844_v29 }
 0x330   : >> { %v872_v32 = vpack.c.bf16 %v860_v21, %v859_v28 }
 0x331   : >> { %v817_v37 = vpop.f32.mrf.mxu3 }
 0x332   : >> { %900 = vmatmul.bf16.gmra.mxu0 %v872_v32  ;;  %v2876_v20 = vadd.f32 %v817_v37, %v2703_v0 }
 0x334   : >> { %v845_v38 = vmul.f32 %v2876_v20, %v2710_v15 }
 0x336   : >> { %v861_v17 = vadd.f32 %v2229_v56, %v845_v38 }
 0x339   : >> { %v819_v25 = vpop.f32.mrf.mxu3 }
 0x33a   : >> { %v2881_v33 = vadd.f32 %v819_v25, %v2703_v0 }
 0x33c   : >> { %v846_v40 = vmul.f32 %v2881_v33, %v2710_v15 }
 0x33e   : >> { %v862_v29 = vadd.f32 %v2225_v57, %v846_v40 }
 0x340   : >> { %v873_v28 = vpack.c.bf16 %v862_v29, %v861_v17 }
 0x341   : >> { %v822_v21 = vpop.f32.mrf.mxu3 }
 0x342   : >> { %905 = vmatmul.bf16.gmra.mxu0 %v873_v28  ;;  %v2888_v32 = vadd.f32 %v822_v21, %v2703_v0 }
 0x344   : >> { %v847_v41 = vmul.f32 %v2888_v32, %v2710_v15 }
 0x346   : >> { %v863_v38 = vadd.f32 %v2221_v58, %v847_v41 }
 0x349   : >> { %v824_v37 = vpop.f32.mrf.mxu3 }
 0x34a   : >> { %v2893_v25 = vadd.f32 %v824_v37, %v2703_v0 }
 0x34c   : >> { %v848_v42 = vmul.f32 %v2893_v25, %v2710_v15 }
 0x34e   : >> { %v864_v40 = vadd.f32 %v2217_v59, %v848_v42 }
 0x350   : >> { %v874_v17 = vpack.c.bf16 %v864_v40, %v863_v38 }
 0x351   : >> { %v827_v29 = vpop.f32.mrf.mxu3 }
 0x352   : >> { %910 = vmatmul.bf16.gmra.mxu0 %v874_v17  ;;  %v2900_v28 = vadd.f32 %v827_v29, %v2703_v0 }
 0x354   : >> { %v849_v44 = vmul.f32 %v2900_v28, %v2710_v15 }
 0x356   : >> { %v865_v41 = vadd.f32 %v2213_v60, %v849_v44 }
 0x359   : >> { %v829_v21 = vpop.f32.mrf.mxu3 }
 0x35a   : >> { %v2905_v37 = vadd.f32 %v829_v21, %v2703_v0 }
 0x35c   : >> { %v850_v45 = vmul.f32 %v2905_v37, %v2710_v15 }
 0x35e   : >> { %v866_v42 = vadd.f32 %v2209_v61, %v850_v45 }
 0x360   : >> { %v875_v38 = vpack.c.bf16 %v866_v42, %v865_v41 }
 0x361   : >> { %v832_v40 = vpop.f32.mrf.mxu3 }
 0x362   : >> { %915 = vmatmul.bf16.gmra.mxu0 %v875_v38  ;;  %v2912_v17 = vadd.f32 %v832_v40, %v2703_v0 }
 0x364   : >> { %v851_v46 = vmul.f32 %v2912_v17, %v2710_v15 }
 0x366   : >> { %v867_v44 = vadd.f32 %v2205_v62, %v851_v46 }
 0x369   : >> { %v834_v29 = vpop.f32.mrf.mxu3 }
 0x36a   : >> { %v2917_v21 = vadd.f32 %v834_v29, %v2703_v0 }
 0x36c   : >> { %3358 = vst [vmem:[#allocation51_spill] sm:$0xff] %v2917_v21  ;;  %v852_v47 = vmul.f32 %v2917_v21, %v2710_v15 }
 0x36e   : >> { %v868_v45 = vadd.f32 %v2201_v63, %v852_v47 }
 0x370   : >> { %v876_v41 = vpack.c.bf16 %v868_v45, %v867_v44 }
 0x372   : >> { %920 = vmatmul.bf16.gmra.mxu0 %v876_v41 }
 0x37f   : >> { %v886_v42 = vpop.f32.mrf.mxu0 }
 0x380   : >> { %v887_v40 = vadd.f32 %v886_v42, %v2809_v26 }
 0x387   : >> { %v888_v38 = vpop.f32.mrf.mxu0 }
 0x388   : >> { %v889_v48 = vadd.f32 %v888_v38, %v2809_v26 }
 0x38a   : >> { %v926_v49 = vpack.c.bf16 %v889_v48, %v887_v40 }
 0x38c   : >> { %v934_v51 = vunpack.c.l.bf16 %v926_v49  ;;  %v935_v50 = vunpack.c.h.bf16 %v926_v49 }
 0x38e   : >> { %1891 = vtanh.f32 %v934_v51 }
 0x38f   : >> { %1893 = vtanh.f32 %v935_v50  ;;  %v891_v29 = vpop.f32.mrf.mxu0 }
 0x390   : >> { %v892_v47 = vadd.f32 %v891_v29, %v2809_v26 }
 0x394   : >> { %v1892_v24 = vpop.eup %1891 }
 0x395   : >> { %v1894_v15 = vpop.eup %1893 }
 0x396   : >> { %v966_v21 = vpack.c.bf16 %v1894_v15, %v1892_v24 }
 0x397   : >> { %v893_v46 = vpop.f32.mrf.mxu0 }
 0x398   : >> { %v894_v44 = vadd.f32 %v893_v46, %v2809_v26  ;;  %982 = vmatmul.bf16.vlgmr.msrb.gmra.mxu1 %v966_v21 }
 0x39a   : >> { %v927_v45 = vpack.c.bf16 %v894_v44, %v892_v47 }
 0x39c   : >> { %v936_v41 = vunpack.c.l.bf16 %v927_v45  ;;  %v937_v42 = vunpack.c.h.bf16 %v927_v45 }
 0x39e   : >> { %1895 = vtanh.f32 %v936_v41 }
 0x39f   : >> { %1897 = vtanh.f32 %v937_v42  ;;  %v896_v48 = vpop.f32.mrf.mxu0 }
 0x3a0   : >> { %v897_v40 = vadd.f32 %v896_v48, %v2809_v26 }
 0x3a4   : >> { %v1896_v38 = vpop.eup %1895 }
 0x3a5   : >> { %v1898_v49 = vpop.eup %1897 }
 0x3a6   : >> { %v967_v51 = vpack.c.bf16 %v1898_v49, %v1896_v38 }
 0x3a7   : >> { %v898_v50 = vpop.f32.mrf.mxu0 }
 0x3a8   : >> { %v899_v24 = vadd.f32 %v898_v50, %v2809_v26  ;;  %987 = vmatmul.bf16.gmra.mxu1 %v967_v51 }
 0x3aa   : >> { %v928_v15 = vpack.c.bf16 %v899_v24, %v897_v40 }
 0x3ac   : >> { %v938_v29 = vunpack.c.l.bf16 %v928_v15  ;;  %v939_v63 = vunpack.c.h.bf16 %v928_v15 }
 0x3ae   : >> { %1899 = vtanh.f32 %v938_v29 }
 0x3af   : >> { %1901 = vtanh.f32 %v939_v63  ;;  %v901_v21 = vpop.f32.mrf.mxu0 }
 0x3b0   : >> { %v902_v41 = vadd.f32 %v901_v21, %v2809_v26 }
 0x3b4   : >> { %v1900_v46 = vpop.eup %1899 }
 0x3b5   : >> { %v1902_v47 = vpop.eup %1901 }
 0x3b6   : >> { %v968_v44 = vpack.c.bf16 %v1902_v47, %v1900_v46 }
 0x3b7   : >> { %v903_v45 = vpop.f32.mrf.mxu0 }
 0x3b8   : >> { %v904_v42 = vadd.f32 %v903_v45, %v2809_v26  ;;  %992 = vmatmul.bf16.gmra.mxu1 %v968_v44 }
 0x3ba   : >> { %v929_v38 = vpack.c.bf16 %v904_v42, %v902_v41 }
 0x3bc   : >> { %v940_v48 = vunpack.c.l.bf16 %v929_v38  ;;  %v941_v49 = vunpack.c.h.bf16 %v929_v38 }
 0x3be   : >> { %1903 = vtanh.f32 %v940_v48 }
 0x3bf   : >> { %1905 = vtanh.f32 %v941_v49  ;;  %v906_v51 = vpop.f32.mrf.mxu0 }
 0x3c0   : >> { %v907_v15 = vadd.f32 %v906_v51, %v2809_v26 }
 0x3c4   : >> { %v1904_v50 = vpop.eup %1903 }
 0x3c5   : >> { %v1906_v40 = vpop.eup %1905 }
 0x3c6   : >> { %v969_v24 = vpack.c.bf16 %v1906_v40, %v1904_v50 }
 0x3c7   : >> { %v908_v63 = vpop.f32.mrf.mxu0 }
 0x3c8   : >> { %v909_v29 = vadd.f32 %v908_v63, %v2809_v26  ;;  %997 = vmatmul.bf16.gmra.mxu1 %v969_v24 }
 0x3ca   : >> { %v930_v46 = vpack.c.bf16 %v909_v29, %v907_v15 }
 0x3cc   : >> { %v942_v21 = vunpack.c.l.bf16 %v930_v46  ;;  %v943_v47 = vunpack.c.h.bf16 %v930_v46 }
 0x3ce   : >> { %1907 = vtanh.f32 %v942_v21 }
 0x3cf   : >> { %1909 = vtanh.f32 %v943_v47  ;;  %v911_v44 = vpop.f32.mrf.mxu0 }
 0x3d0   : >> { %v912_v48 = vadd.f32 %v911_v44, %v2809_v26 }
 0x3d4   : >> { %v1908_v45 = vpop.eup %1907 }
 0x3d5   : >> { %v1910_v41 = vpop.eup %1909 }
 0x3d6   : >> { %v970_v42 = vpack.c.bf16 %v1910_v41, %v1908_v45 }
 0x3d7   : >> { %v913_v38 = vpop.f32.mrf.mxu0 }
 0x3d8   : >> { %v914_v49 = vadd.f32 %v913_v38, %v2809_v26  ;;  %1002 = vmatmul.bf16.gmra.mxu1 %v970_v42 }
 0x3da   : >> { %v931_v50 = vpack.c.bf16 %v914_v49, %v912_v48 }
 0x3dc   : >> { %v944_v51 = vunpack.c.l.bf16 %v931_v50  ;;  %v945_v40 = vunpack.c.h.bf16 %v931_v50 }
 0x3de   : >> { %1911 = vtanh.f32 %v944_v51 }
 0x3df   : >> { %1913 = vtanh.f32 %v945_v40  ;;  %v916_v24 = vpop.f32.mrf.mxu0 }
 0x3e0   : >> { %v917_v21 = vadd.f32 %v916_v24, %v2809_v26 }
 0x3e4   : >> { %v1912_v63 = vpop.eup %1911 }
 0x3e5   : >> { %v1914_v15 = vpop.eup %1913 }
 0x3e6   : >> { %v971_v29 = vpack.c.bf16 %v1914_v15, %v1912_v63 }
 0x3e7   : >> { %v918_v46 = vpop.f32.mrf.mxu0 }
 0x3e8   : >> { %v919_v47 = vadd.f32 %v918_v46, %v2809_v26  ;;  %1007 = vmatmul.bf16.gmra.mxu1 %v971_v29 }
 0x3ea   : >> { %v932_v45 = vpack.c.bf16 %v919_v47, %v917_v21  ;;  %v1216_v47 = vmul.f32 2.0, %v2828_v12 }
 0x3ec   : >> { %v946_v44 = vunpack.c.l.bf16 %v932_v45  ;;  %v947_v41 = vunpack.c.h.bf16 %v932_v45 }
 0x3ee   : >> { %1915 = vtanh.f32 %v946_v44 }
 0x3ef   : >> { %1917 = vtanh.f32 %v947_v41  ;;  %v921_v42 = vpop.f32.mrf.mxu0  ;;  %v1232_v41 = vadd.f32 %v1216_v47, %v2706_v2 }
 0x3f0   : >> { %v922_v51 = vadd.f32 %v921_v42, %v2809_v26 }
 0x3f4   : >> { %v1916_v38 = vpop.eup %1915 }
 0x3f5   : >> { %v1918_v48 = vpop.eup %1917 }
 0x3f6   : >> { %v972_v49 = vpack.c.bf16 %v1918_v48, %v1916_v38  ;;  %v2945_v38 = vstv %s2529_s12  ;;  %v1217_v48 = vmul.f32 2.0, %v2833_v13  ;;  %s1357_s12 = scalar_lea.hbm (%p3163_p1), %s3277_s6, %s1606_s18 }
 0x3f7   : >> { %v923_v50 = vpop.f32.mrf.mxu0  ;;  %s1360_s13 = sshll.u32 (%p3163_p1), %s1357_s12, 4  ;;  %s1361_s13 = int_to_ptr.hbm [resolvable:$true] %s1360_s13 }
 0x3f8   : >> { %v924_v40 = vadd.f32 %v923_v50, %v2809_v26  ;;  %1012 = vmatmul.bf16.gmra.mxu1 %v972_v49 }
 0x3fa   : >> { %v933_v24 = vpack.c.bf16 %v924_v40, %v922_v51  ;;  %v1233_v40 = vadd.f32 %v1217_v48, %v2715_v23 }
 0x3fc   : >> { %v948_v63 = vunpack.c.l.bf16 %v933_v24  ;;  %v949_v15 = vunpack.c.h.bf16 %v933_v24 }
 0x3fe   : >> { %1919 = vtanh.f32 %v948_v63 }
 0x3ff   : >> { %1921 = vtanh.f32 %v949_v15 }
 0x404   : >> { %v1920_v29 = vpop.eup %1919 }
 0x405   : >> { %v1922_v46 = vpop.eup %1921 }
 0x406   : >> { %v973_v21 = vpack.c.bf16 %v1922_v46, %v1920_v29  ;;  %v1218_v29 = vmul.f32 2.0, %v2840_v27 }
 0x408   : >> { %1017 = vmatmul.bf16.gmra.mxu1 %v973_v21  ;;  %v1234_v47 = vadd.f32 %v1218_v29, %v2722_v7 }
 0x415   : >> { %v983_v45 = vpop.f32.mrf.mxu1 }
 0x416   : >> { %v984_v44 = vadd.f32 %v983_v45, %v2703_v0 }
 0x418   : >> { %v1248_v42 = vmul.f32 2.0, %v984_v44  ;;  %v1025_v50 = vmul.f32 %v2945_v38, %v984_v44  ;;  %v1219_v44 = vmul.f32 2.0, %v2845_v16 }
 0x41a   : >> { %v2942_v26 = vadd.f32 %v1248_v42, %v1232_v41  ;;  %v1041_v63 = vadd.f32 %v2261_v10, %v1025_v50 }
 0x41d   : >> { %v985_v49 = vpop.f32.mrf.mxu1 }
 0x41e   : >> { %v986_v51 = vadd.f32 %v985_v49, %v2703_v0  ;;  %v1235_v49 = vadd.f32 %v1219_v44, %v2727_v6 }
 0x420   : >> { %v1026_v12 = vmul.f32 %v2945_v38, %v986_v51  ;;  %v1249_v24 = vmul.f32 2.0, %v986_v51 }
 0x422   : >> { %v1042_v2 = vadd.f32 %v2257_v14, %v1026_v12  ;;  %v2954_v15 = vadd.f32 %v1249_v24, %v1233_v40  ;;  %v1220_v12 = vmul.f32 2.0, %v2852_v19 }
 0x424   : >> { %v1057_v46 = vpack.c.bf16 %v1042_v2, %v1041_v63  ;;  %v1236_v2 = vadd.f32 %v1220_v12, %v2734_v3 }
 0x425   : >> { %v988_v13 = vpop.f32.mrf.mxu1 }
 0x426   : >> { %v989_v21 = vadd.f32 %v988_v13, %v2703_v0  ;;  %1078 = vmatmul.bf16.vlgmr.msrb.gmra.mxu2 %v1057_v46  ;;  %v1221_v46 = vmul.f32 2.0, %v2857_v30 }
 0x428   : >> { %v1250_v45 = vmul.f32 2.0, %v989_v21  ;;  %v1027_v42 = vmul.f32 %v2945_v38, %v989_v21 }
 0x42a   : >> { %v2959_v23 = vadd.f32 %v1250_v45, %v1234_v47  ;;  %v1043_v51 = vadd.f32 %v2253_v18, %v1027_v42  ;;  %v1237_v45 = vadd.f32 %v1221_v46, %v2739_v5 }
 0x42d   : >> { %v990_v41 = vpop.f32.mrf.mxu1 }
 0x42e   : >> { %v991_v48 = vadd.f32 %v990_v41, %v2703_v0 }
 0x430   : >> { %v1028_v27 = vmul.f32 %v2945_v38, %v991_v48  ;;  %v1251_v50 = vmul.f32 2.0, %v991_v48  ;;  %v1222_v48 = vmul.f32 2.0, %v2864_v34 }
 0x432   : >> { %v1044_v40 = vadd.f32 %v2249_v22, %v1028_v27  ;;  %v2968_v7 = vadd.f32 %v1251_v50, %v1235_v49  ;;  %v1238_v50 = vadd.f32 %v1222_v48, %v2746_v35 }
 0x434   : >> { %v1058_v24 = vpack.c.bf16 %v1044_v40, %v1043_v51  ;;  %v1223_v40 = vmul.f32 2.0, %v2869_v36 }
 0x435   : >> { %v993_v16 = vpop.f32.mrf.mxu1 }
 0x436   : >> { %v994_v63 = vadd.f32 %v993_v16, %v2703_v0  ;;  %1083 = vmatmul.bf16.gmra.mxu2 %v1058_v24 }
 0x438   : >> { %v1252_v29 = vmul.f32 2.0, %v994_v63  ;;  %v1029_v21 = vmul.f32 %v2945_v38, %v994_v63  ;;  %v1239_v63 = vadd.f32 %v1223_v40, %v2751_v4 }
 0x43a   : >> { %v2973_v6 = vadd.f32 %v1252_v29, %v1236_v2  ;;  %v1045_v41 = vadd.f32 %v2245_v52, %v1029_v21 }
 0x43d   : >> { %v995_v13 = vpop.f32.mrf.mxu1 }
 0x43e   : >> { %v996_v47 = vadd.f32 %v995_v13, %v2703_v0  ;;  %v1224_v13 = vmul.f32 2.0, %v2876_v20 }
 0x440   : >> { %v1030_v19 = vmul.f32 %v2945_v38, %v996_v47  ;;  %v1253_v44 = vmul.f32 2.0, %v996_v47 }
 0x442   : >> { %v1046_v42 = vadd.f32 %v2241_v53, %v1030_v19  ;;  %v2982_v3 = vadd.f32 %v1253_v44, %v1237_v45  ;;  %v1240_v45 = vadd.f32 %v1224_v13, %v2758_v39  ;;  %v1225_v44 = vmul.f32 2.0, %v2881_v33 }
 0x444   : >> { %v1059_v49 = vpack.c.bf16 %v1046_v42, %v1045_v41 }
 0x445   : >> { %v998_v30 = vpop.f32.mrf.mxu1 }
 0x446   : >> { %v999_v27 = vadd.f32 %v998_v30, %v2703_v0  ;;  %1088 = vmatmul.bf16.gmra.mxu2 %v1059_v49  ;;  %v1241_v49 = vadd.f32 %v1225_v44, %v2763_v43 }
 0x448   : >> { %v1254_v51 = vmul.f32 2.0, %v999_v27  ;;  %v1031_v24 = vmul.f32 %v2945_v38, %v999_v27 }
 0x44a   : >> { %v2987_v5 = vadd.f32 %v1254_v51, %v1238_v50  ;;  %v1047_v29 = vadd.f32 %v2237_v54, %v1031_v24  ;;  %v1226_v51 = vmul.f32 2.0, %v2888_v32 }
 0x44c   : >> { %v1242_v24 = vadd.f32 %v1226_v51, %v2770_v8 }
 0x44d   : >> { %v1000_v12 = vpop.f32.mrf.mxu1 }
 0x44e   : >> { %v1001_v16 = vadd.f32 %v1000_v12, %v2703_v0 }
 0x450   : >> { %v1032_v34 = vmul.f32 %v2945_v38, %v1001_v16  ;;  %v1255_v2 = vmul.f32 2.0, %v1001_v16 }
 0x452   : >> { %v1048_v46 = vadd.f32 %v2233_v55, %v1032_v34  ;;  %v2996_v35 = vadd.f32 %v1255_v2, %v1239_v63  ;;  %v1227_v63 = vmul.f32 2.0, %v2893_v25 }
 0x454   : >> { %v1060_v21 = vpack.c.bf16 %v1048_v46, %v1047_v29  ;;  %v1243_v46 = vadd.f32 %v1227_v63, %v2775_v11  ;;  %v3359_v63 = vld [vmem:[#allocation51_spill] sm:$0xff] }
 0x455   : >> { %v1003_v36 = vpop.f32.mrf.mxu1 }
 0x456   : >> { %v1004_v47 = vadd.f32 %v1003_v36, %v2703_v0  ;;  %1093 = vmatmul.bf16.gmra.mxu2 %v1060_v21 }
 0x458   : >> { %v1256_v19 = vmul.f32 2.0, %v1004_v47  ;;  %v1033_v42 = vmul.f32 %v2945_v38, %v1004_v47  ;;  %v1228_v47 = vmul.f32 2.0, %v2900_v28 }
 0x45a   : >> { %v3001_v4 = vadd.f32 %v1256_v19, %v1240_v45  ;;  %v1049_v27 = vadd.f32 %v2229_v56, %v1033_v42  ;;  %v1244_v44 = vadd.f32 %v1228_v47, %v2782_v1  ;;  %v1229_v42 = vmul.f32 2.0, %v2905_v37  ;;  %v3361_v47 = vld [vmem:[#allocation49_spill] sm:$0xff] }
 0x45d   : >> { %v1005_v41 = vpop.f32.mrf.mxu1 }
 0x45e   : >> { %v1006_v48 = vadd.f32 %v1005_v41, %v2703_v0 }
 0x460   : >> { %v1034_v20 = vmul.f32 %v2945_v38, %v1006_v48  ;;  %v1257_v30 = vmul.f32 2.0, %v1006_v48 }
 0x462   : >> { %v1050_v50 = vadd.f32 %v2225_v57, %v1034_v20  ;;  %v3010_v39 = vadd.f32 %v1257_v30, %v1241_v49  ;;  %v1245_v30 = vadd.f32 %v1229_v42, %v2787_v31 }
 0x464   : >> { %v1061_v40 = vpack.c.bf16 %v1050_v50, %v1049_v27 }
 0x465   : >> { %v1008_v33 = vpop.f32.mrf.mxu1 }
 0x466   : >> { %v1009_v12 = vadd.f32 %v1008_v33, %v2703_v0  ;;  %1098 = vmatmul.bf16.gmra.mxu2 %v1061_v40  ;;  %v1230_v40 = vmul.f32 2.0, %v2912_v17  ;;  %v3360_v17 = vld [vmem:[#allocation50_spill] sm:$0xff] }
 0x468   : >> { %v1258_v16 = vmul.f32 2.0, %v1009_v12  ;;  %v1035_v2 = vmul.f32 %v2945_v38, %v1009_v12  ;;  %v1246_v31 = vadd.f32 %v1230_v40, %v2794_v9 }
 0x46a   : >> { %v3015_v43 = vadd.f32 %v1258_v16, %v1242_v24  ;;  %v1051_v21 = vadd.f32 %v2221_v58, %v1035_v2 }
 0x46d   : >> { %v1010_v34 = vpop.f32.mrf.mxu1 }
 0x46e   : >> { %v1011_v29 = vadd.f32 %v1010_v34, %v2703_v0  ;;  %v1231_v34 = vmul.f32 2.0, %v3359_v63 }
 0x470   : >> { %v1036_v32 = vmul.f32 %v2945_v38, %v1011_v29  ;;  %v1259_v13 = vmul.f32 2.0, %v1011_v29 }
 0x472   : >> { %v1052_v36 = vadd.f32 %v2217_v59, %v1036_v32  ;;  %v3024_v8 = vadd.f32 %v1259_v13, %v1243_v46  ;;  %v1247_v32 = vadd.f32 %v1231_v34, %v3360_v17 }
 0x474   : >> { %v1062_v45 = vpack.c.bf16 %v1052_v36, %v1051_v21 }
 0x475   : >> { %v1013_v25 = vpop.f32.mrf.mxu1 }
 0x476   : >> { %v1014_v19 = vadd.f32 %v1013_v25, %v2703_v0  ;;  %1103 = vmatmul.bf16.gmra.mxu2 %v1062_v45 }
 0x478   : >> { %v1260_v41 = vmul.f32 2.0, %v1014_v19  ;;  %v1037_v49 = vmul.f32 %v2945_v38, %v1014_v19  ;;  %v1065_v19 = vstv %s1023_s17 }
 0x47a   : >> { %v3029_v11 = vadd.f32 %v1260_v41, %v1244_v44  ;;  %v1053_v50 = vadd.f32 %v2213_v60, %v1037_v49  ;;  %v3362_v41 = vld [vmem:[#allocation47_spill] sm:$0xff] }
 0x47b   : >> { %v1066_v42 = vmul.f32 %v1065_v19, %v3362_v41 }
 0x47d   : >> { %v1015_v48 = vpop.f32.mrf.mxu1 }
 0x47e   : >> { %v1016_v20 = vadd.f32 %v1015_v48, %v2703_v0  ;;  %v3057_v48 = vperm.slane %v1066_v42, 0 }
 0x480   : >> { %v1038_v28 = vmul.f32 %v2945_v38, %v1016_v20  ;;  %v1261_v27 = vmul.f32 2.0, %v1016_v20 }
 0x482   : >> { %v1054_v51 = vadd.f32 %v2209_v61, %v1038_v28  ;;  %v3038_v1 = vadd.f32 %v1261_v27, %v1245_v30 }
 0x484   : >> { %v1063_v33 = vpack.c.bf16 %v1054_v51, %v1053_v50 }
 0x485   : >> { %v1018_v37 = vpop.f32.mrf.mxu1 }
 0x486   : >> { %v1019_v12 = vadd.f32 %v1018_v37, %v2703_v0  ;;  %1108 = vmatmul.bf16.gmra.mxu2 %v1063_v33 }
 0x488   : >> { %v1262_v24 = vmul.f32 2.0, %v1019_v12  ;;  %v1039_v29 = vmul.f32 %v2945_v38, %v1019_v12 }
 0x48a   : >> { %v3043_v16 = vadd.f32 %v1262_v24, %v1246_v31  ;;  %v1055_v36 = vadd.f32 %v2205_v62, %v1039_v29 }
 0x48d   : >> { %v1020_v2 = vpop.f32.mrf.mxu1 }
 0x48e   : >> { %v1021_v46 = vadd.f32 %v1020_v2, %v2703_v0 }
 0x490   : >> { %v1040_v13 = vmul.f32 %v2945_v38, %v1021_v46  ;;  %v1263_v21 = vmul.f32 2.0, %v1021_v46 }
 0x492   : >> { %v1056_v45 = vadd.f32 %v3361_v47, %v1040_v13  ;;  %v3052_v9 = vadd.f32 %v1263_v21, %v1247_v32 }
 0x494   : >> { %v1064_v25 = vpack.c.bf16 %v1056_v45, %v1055_v36 }
 0x496   : >> { %1113 = vmatmul.bf16.gmra.mxu2 %v1064_v25 }
 0x4a9   : >> { %v1079_v44 = vpop.f32.mrf.mxu2 }
 0x4aa   : >> { %v1080_v20 = vadd.f32 %v1079_v44, %v3057_v48 }
 0x4b1   : >> { %v1081_v49 = vpop.f32.mrf.mxu2 }
 0x4b2   : >> { %v1082_v38 = vadd.f32 %v1081_v49, %v3057_v48 }
 0x4b4   : >> { %v1119_v30 = vpack.c.bf16 %v1082_v38, %v1080_v20 }
 0x4b6   : >> { %v1127_v28 = vunpack.c.l.bf16 %v1119_v30  ;;  %v1128_v27 = vunpack.c.h.bf16 %v1119_v30 }
 0x4b8   : >> { %1923 = vtanh.f32 %v1127_v28 }
 0x4b9   : >> { %1925 = vtanh.f32 %v1128_v27  ;;  %v1084_v50 = vpop.f32.mrf.mxu2 }
 0x4ba   : >> { %v1085_v12 = vadd.f32 %v1084_v50, %v3057_v48 }
 0x4be   : >> { %v1924_v51 = vpop.eup %1923 }
 0x4bf   : >> { %v1926_v40 = vpop.eup %1925 }
 0x4c0   : >> { %v1159_v33 = vpack.c.bf16 %v1926_v40, %v1924_v51 }
 0x4c1   : >> { %v1086_v37 = vpop.f32.mrf.mxu2 }
 0x4c2   : >> { %v1087_v31 = vadd.f32 %v1086_v37, %v3057_v48  ;;  %1175 = vmatmul.bf16.vlgmr.msrb.gmra.mxu3 %v1159_v33 }
 0x4c4   : >> { %v1120_v24 = vpack.c.bf16 %v1087_v31, %v1085_v12 }
 0x4c6   : >> { %v1129_v63 = vunpack.c.l.bf16 %v1120_v24  ;;  %v1130_v34 = vunpack.c.h.bf16 %v1120_v24 }
 0x4c8   : >> { %1927 = vtanh.f32 %v1129_v63 }
 0x4c9   : >> { %1929 = vtanh.f32 %v1130_v34  ;;  %v1089_v2 = vpop.f32.mrf.mxu2 }
 0x4ca   : >> { %v1090_v13 = vadd.f32 %v1089_v2, %v3057_v48 }
 0x4ce   : >> { %v1928_v29 = vpop.eup %1927 }
 0x4cf   : >> { %v1930_v46 = vpop.eup %1929 }
 0x4d0   : >> { %v1160_v17 = vpack.c.bf16 %v1930_v46, %v1928_v29 }
 0x4d1   : >> { %v1091_v32 = vpop.f32.mrf.mxu2 }
 0x4d2   : >> { %v1092_v21 = vadd.f32 %v1091_v32, %v3057_v48  ;;  %1180 = vmatmul.bf16.gmra.mxu3 %v1160_v17 }
 0x4d4   : >> { %v1121_v36 = vpack.c.bf16 %v1092_v21, %v1090_v13 }
 0x4d6   : >> { %v1131_v45 = vunpack.c.l.bf16 %v1121_v36  ;;  %v1132_v25 = vunpack.c.h.bf16 %v1121_v36 }
 0x4d8   : >> { %1931 = vtanh.f32 %v1131_v45 }
 0x4d9   : >> { %1933 = vtanh.f32 %v1132_v25  ;;  %v1094_v19 = vpop.f32.mrf.mxu2 }
 0x4da   : >> { %v1095_v20 = vadd.f32 %v1094_v19, %v3057_v48 }
 0x4de   : >> { %v1932_v44 = vpop.eup %1931 }
 0x4df   : >> { %v1934_v41 = vpop.eup %1933 }
 0x4e0   : >> { %v1161_v42 = vpack.c.bf16 %v1934_v41, %v1932_v44 }
 0x4e1   : >> { %v1096_v49 = vpop.f32.mrf.mxu2 }
 0x4e2   : >> { %v1097_v38 = vadd.f32 %v1096_v49, %v3057_v48  ;;  %1185 = vmatmul.bf16.gmra.mxu3 %v1161_v42 }
 0x4e4   : >> { %v1122_v30 = vpack.c.bf16 %v1097_v38, %v1095_v20 }
 0x4e6   : >> { %v1133_v28 = vunpack.c.l.bf16 %v1122_v30  ;;  %v1134_v27 = vunpack.c.h.bf16 %v1122_v30 }
 0x4e8   : >> { %1935 = vtanh.f32 %v1133_v28 }
 0x4e9   : >> { %1937 = vtanh.f32 %v1134_v27  ;;  %v1099_v50 = vpop.f32.mrf.mxu2 }
 0x4ea   : >> { %v1100_v12 = vadd.f32 %v1099_v50, %v3057_v48 }
 0x4ee   : >> { %v1936_v51 = vpop.eup %1935 }
 0x4ef   : >> { %v1938_v40 = vpop.eup %1937 }
 0x4f0   : >> { %v1162_v33 = vpack.c.bf16 %v1938_v40, %v1936_v51 }
 0x4f1   : >> { %v1101_v37 = vpop.f32.mrf.mxu2 }
 0x4f2   : >> { %v1102_v31 = vadd.f32 %v1101_v37, %v3057_v48  ;;  %1190 = vmatmul.bf16.gmra.mxu3 %v1162_v33 }
 0x4f4   : >> { %v1123_v24 = vpack.c.bf16 %v1102_v31, %v1100_v12 }
 0x4f6   : >> { %v1135_v63 = vunpack.c.l.bf16 %v1123_v24  ;;  %v1136_v34 = vunpack.c.h.bf16 %v1123_v24 }
 0x4f8   : >> { %1939 = vtanh.f32 %v1135_v63 }
 0x4f9   : >> { %1941 = vtanh.f32 %v1136_v34  ;;  %v1104_v2 = vpop.f32.mrf.mxu2 }
 0x4fa   : >> { %v1105_v13 = vadd.f32 %v1104_v2, %v3057_v48 }
 0x4fe   : >> { %v1940_v29 = vpop.eup %1939 }
 0x4ff   : >> { %v1942_v46 = vpop.eup %1941 }
 0x500   : >> { %v1163_v17 = vpack.c.bf16 %v1942_v46, %v1940_v29 }
 0x501   : >> { %v1106_v32 = vpop.f32.mrf.mxu2 }
 0x502   : >> { %v1107_v21 = vadd.f32 %v1106_v32, %v3057_v48  ;;  %1195 = vmatmul.bf16.gmra.mxu3 %v1163_v17 }
 0x504   : >> { %v1124_v36 = vpack.c.bf16 %v1107_v21, %v1105_v13  ;;  %v3079_v13 = vstv %s310_s14  ;;  %s2071_s14 = sshra.s32 (%p3163_p1), %s1361_s13, 4  ;;  %s2072_s14 = int_to_ptr.hbm [resolvable:$true] %s2071_s14 }
 0x505   : > { %s2073_s20 = scalar_lea.hbm (%p3163_p1), %s2072_s14, 128  ;;  %p2078_p2 = scmp.lt.s32.totalorder (%p3163_p1), %s2072_s14, %s3277_s6 }
 0x506   : >> { %v1137_v45 = vunpack.c.l.bf16 %v1124_v36  ;;  %v1138_v25 = vunpack.c.h.bf16 %v1124_v36  ;;  %p2074_p4 = scmp.ne.s32.totalorder (%p3163_p1), %s2072_s14, %s2073_s20  ;;  %p2079_p9 = scmp.lt.s32.totalorder (%p3163_p1), %s2077_s11, %s2073_s20 }
 0x508   : >> { %1943 = vtanh.f32 %v1137_v45  ;;  %p2075_p8 = pnand (%p3163_p1), %p2074_p4, %p2382_p3  ;;  %p2080_p10 = por (%p3163_p1), %p2079_p9, %p2078_p2 }
 0x509   : >> { %1945 = vtanh.f32 %v1138_v25  ;;  %v1109_v19 = vpop.f32.mrf.mxu2 }
 0x50a   : >> { %v1110_v20 = vadd.f32 %v1109_v19, %v3057_v48  ;;  %p2076_p11 = pneg (%p3163_p1), %p2075_p8 }
 0x50c   : > { %p2081_p12 = pnand (%p3163_p1), %p2080_p10, %p2076_p11 }
 0x50e   : >> { %v1944_v44 = vpop.eup %1943 }
 0x50f   : >> { %v1946_v41 = vpop.eup %1945 }
 0x510   : >> { %v1164_v42 = vpack.c.bf16 %v1946_v41, %v1944_v44 }
 0x511   : >> { %v1111_v49 = vpop.f32.mrf.mxu2 }
 0x512   : >> { %v1112_v38 = vadd.f32 %v1111_v49, %v3057_v48  ;;  %1200 = vmatmul.bf16.gmra.mxu3 %v1164_v42 }
 0x514   : >> { %v1125_v30 = vpack.c.bf16 %v1112_v38, %v1110_v20 }
 0x516   : >> { %v1139_v28 = vunpack.c.l.bf16 %v1125_v30  ;;  %v1140_v27 = vunpack.c.h.bf16 %v1125_v30 }
 0x518   : >> { %1947 = vtanh.f32 %v1139_v28 }
 0x519   : >> { %1949 = vtanh.f32 %v1140_v27  ;;  %v1114_v50 = vpop.f32.mrf.mxu2 }
 0x51a   : >> { %v1115_v12 = vadd.f32 %v1114_v50, %v3057_v48 }
 0x51e   : >> { %v1948_v51 = vpop.eup %1947 }
 0x51f   : >> { %v1950_v40 = vpop.eup %1949 }
 0x520   : >> { %v1165_v33 = vpack.c.bf16 %v1950_v40, %v1948_v51 }
 0x521   : >> { %v1116_v37 = vpop.f32.mrf.mxu2 }
 0x522   : >> { %v1117_v31 = vadd.f32 %v1116_v37, %v3057_v48  ;;  %1205 = vmatmul.bf16.gmra.mxu3 %v1165_v33 }
 0x524   : >> { %v1126_v24 = vpack.c.bf16 %v1117_v31, %v1115_v12 }
 0x526   : >> { %v1141_v63 = vunpack.c.l.bf16 %v1126_v24  ;;  %v1142_v34 = vunpack.c.h.bf16 %v1126_v24 }
 0x528   : >> { %1951 = vtanh.f32 %v1141_v63 }
 0x529   : >> { %1953 = vtanh.f32 %v1142_v34 }
 0x52e   : >> { %v1952_v2 = vpop.eup %1951 }
 0x52f   : >> { %v1954_v29 = vpop.eup %1953 }
 0x530   : >> { %v1166_v46 = vpack.c.bf16 %v1954_v29, %v1952_v2 }
 0x532   : >> { %1210 = vmatmul.bf16.gmra.mxu3 %v1166_v46 }
 0x545   : >> { %v1176_v17 = vpop.f32.mrf.mxu3 }
 0x546   : >> { %v1177_v32 = vadd.f32 %v1176_v17, %v2703_v0 }
 0x548   : >> { %v1280_v21 = vadd.f32 %v2942_v26, %v1177_v32 }
 0x54a   : >> { %v1297_v48 = vmul.f32 %v3079_v13, %v1280_v21 }
 0x54c   : >> { %v3084_v10 = vadd.f32 %v2261_v10, %v1297_v48  }
 0x54d   : >> { %v1178_v45 = vpop.f32.mrf.mxu3 }
 0x54e   : >> { %v3363_v36 = vmov %v3084_v10  ;;  %v1179_v25 = vadd.f32 %v1178_v45, %v2703_v0 }
 0x54f   : > { %1329 = vst [vmem:[%s2538_s22] sm:$0xff] (%p3163_p1), %v3363_v36 }
 0x550   : >> { %v1281_v19 = vadd.f32 %v2954_v15, %v1179_v25 }
 0x552   : >> { %v1298_v44 = vmul.f32 %v3079_v13, %v1281_v19 }
 0x554   : >> { %v3090_v14 = vadd.f32 %v2257_v14, %v1298_v44  }
 0x555   : >> { %v1181_v42 = vpop.f32.mrf.mxu3 }
 0x556   : >> { %v3364_v41 = vmov %v3090_v14  ;;  %v1182_v49 = vadd.f32 %v1181_v42, %v2703_v0 }
 0x557   : > { %1330 = vst [vmem:[%s2538_s22 + $0x8] sm:$0xff] (%p3163_p1), %v3364_v41 }
 0x558   : >> { %v1282_v26 = vadd.f32 %v2959_v23, %v1182_v49 }
 0x55a   : >> { %v1299_v20 = vmul.f32 %v3079_v13, %v1282_v26 }
 0x55c   : >> { %v3096_v18 = vadd.f32 %v2253_v18, %v1299_v20  }
 0x55d   : >> { %v1183_v10 = vpop.f32.mrf.mxu3 }
 0x55e   : >> { %v3365_v38 = vmov %v3096_v18  ;;  %v1184_v30 = vadd.f32 %v1183_v10, %v2703_v0 }
 0x55f   : > { %1331 = vst [vmem:[%s2538_s22 + $0x10] sm:$0xff] (%p3163_p1), %v3365_v38 }
 0x560   : >> { %v1283_v15 = vadd.f32 %v2968_v7, %v1184_v30 }
 0x562   : >> { %v1300_v28 = vmul.f32 %v3079_v13, %v1283_v15 }
 0x564   : >> { %v3102_v22 = vadd.f32 %v2249_v22, %v1300_v28  }
 0x565   : >> { %v1186_v14 = vpop.f32.mrf.mxu3 }
 0x566   : >> { %v3366_v27 = vmov %v3102_v22  ;;  %v1187_v50 = vadd.f32 %v1186_v14, %v2703_v0 }
 0x567   : > { %1332 = vst [vmem:[%s2538_s22 + $0x18] sm:$0xff] (%p3163_p1), %v3366_v27 }
 0x568   : >> { %v1284_v23 = vadd.f32 %v2973_v6, %v1187_v50 }
 0x56a   : >> { %v1301_v51 = vmul.f32 %v3079_v13, %v1284_v23 }
 0x56c   : >> { %v3108_v52 = vadd.f32 %v2245_v52, %v1301_v51  }
 0x56d   : >> { %v1188_v18 = vpop.f32.mrf.mxu3 }
 0x56e   : >> { %v3367_v40 = vmov %v3108_v52  ;;  %v1189_v33 = vadd.f32 %v1188_v18, %v2703_v0 }
 0x56f   : > { %1333 = vst [vmem:[%s2538_s22 + $0x20] sm:$0xff] (%p3163_p1), %v3367_v40 }
 0x570   : >> { %v1285_v7 = vadd.f32 %v2982_v3, %v1189_v33 }
 0x572   : >> { %v1302_v37 = vmul.f32 %v3079_v13, %v1285_v7 }
 0x574   : >> { %v3114_v53 = vadd.f32 %v2241_v53, %v1302_v37  }
 0x575   : >> { %v1191_v22 = vpop.f32.mrf.mxu3 }
 0x576   : >> { %v3368_v12 = vmov %v3114_v53  ;;  %v1192_v31 = vadd.f32 %v1191_v22, %v2703_v0  ;;  %v3385_v22 = vmov %v3366_v27 }
 0x577   : > { %1334 = vst [vmem:[%s2538_s22 + $0x28] sm:$0xff] (%p3163_p1), %v3368_v12 }
 0x578   : >> { %v1286_v6 = vadd.f32 %v2987_v5, %v1192_v31 }
 0x57a   : >> { %v1303_v24 = vmul.f32 %v3079_v13, %v1286_v6 }
 0x57c   : >> { %v3120_v54 = vadd.f32 %v2237_v54, %v1303_v24  }
 0x57d   : >> { %v1193_v52 = vpop.f32.mrf.mxu3 }
 0x57e   : >> { %v3369_v34 = vmov %v3120_v54  ;;  %v1194_v63 = vadd.f32 %v1193_v52, %v2703_v0  ;;  %v3384_v52 = vmov %v3367_v40 }
 0x57f   : > { %1335 = vst [vmem:[%s2538_s22 + $0x30] sm:$0xff] (%p3163_p1), %v3369_v34 }
 0x580   : >> { %v1287_v3 = vadd.f32 %v2996_v35, %v1194_v63 }
 0x582   : >> { %v1304_v2 = vmul.f32 %v3079_v13, %v1287_v3 }
 0x584   : >> { %v3126_v55 = vadd.f32 %v2233_v55, %v1304_v2  }
 0x585   : >> { %v1196_v53 = vpop.f32.mrf.mxu3 }
 0x586   : >> { %v3370_v29 = vmov %v3126_v55  ;;  %v1197_v46 = vadd.f32 %v1196_v53, %v2703_v0  ;;  %v3383_v53 = vmov %v3368_v12 }
 0x587   : > { %1336 = vst [vmem:[%s2538_s22 + $0x38] sm:$0xff] (%p3163_p1), %v3370_v29 }
 0x588   : >> { %v1288_v5 = vadd.f32 %v3001_v4, %v1197_v46 }
 0x58a   : >> { %v1305_v17 = vmul.f32 %v3079_v13, %v1288_v5 }
 0x58c   : >> { %v3132_v56 = vadd.f32 %v2229_v56, %v1305_v17  }
 0x58d   : >> { %v1198_v54 = vpop.f32.mrf.mxu3 }
 0x58e   : >> { %v3371_v32 = vmov %v3132_v56  ;;  %v1199_v21 = vadd.f32 %v1198_v54, %v2703_v0  ;;  %v3382_v54 = vmov %v3369_v34 }
 0x58f   : > { %1337 = vst [vmem:[%s2538_s22 + $0x40] sm:$0xff] (%p3163_p1), %v3371_v32 }
 0x590   : >> { %v1289_v35 = vadd.f32 %v3010_v39, %v1199_v21 }
 0x592   : >> { %v1306_v48 = vmul.f32 %v3079_v13, %v1289_v35 }
 0x594   : >> { %v1322_v45 = vadd.f32 %v2225_v57, %v1306_v48  }
 0x595   : >> { %v1201_v55 = vpop.f32.mrf.mxu3 }
 0x596   : >> { %v1202_v25 = vadd.f32 %v1201_v55, %v2703_v0  ;;  %v3381_v55 = vmov %v3370_v29  ;;  %1338 = vst [vmem:[%s2538_s22 + $0x48] sm:$0xff] (%p3163_p1), %v1322_v45 }
 0x598   : >> { %v1290_v19 = vadd.f32 %v3015_v43, %v1202_v25 }
 0x59a   : >> { %v1307_v4 = vmul.f32 %v3079_v13, %v1290_v19 }
 0x59c   : >> { %v1323_v44 = vadd.f32 %v2221_v58, %v1307_v4  }
 0x59d   : >> { %v1203_v42 = vpop.f32.mrf.mxu3 }
 0x59e   : >> { %v1204_v56 = vadd.f32 %v1203_v42, %v2703_v0  ;;  %1339 = vst [vmem:[%s2538_s22 + $0x50] sm:$0xff] (%p3163_p1), %v1323_v44 }
 0x5a0   : >> { %v1291_v49 = vadd.f32 %v3024_v8, %v1204_v56  ;;  %v3380_v56 = vmov %v3371_v32 }
 0x5a2   : >> { %v1308_v39 = vmul.f32 %v3079_v13, %v1291_v49 }
 0x5a4   : >> { %v1324_v26 = vadd.f32 %v2217_v59, %v1308_v39  }
 0x5a5   : >> { %v1206_v20 = vpop.f32.mrf.mxu3 }
 0x5a6   : >> { %v1207_v57 = vadd.f32 %v1206_v20, %v2703_v0  ;;  %1340 = vst [vmem:[%s2538_s22 + $0x58] sm:$0xff] (%p3163_p1), %v1324_v26 }
 0x5a8   : >> { %v1292_v10 = vadd.f32 %v3029_v11, %v1207_v57  ;;  %v3379_v57 = vmov %v1322_v45 }
 0x5aa   : >> { %v1309_v43 = vmul.f32 %v3079_v13, %v1292_v10  ;;  %v3388_v10 = vmov %v3363_v36 }
 0x5ac   : >> { %v1325_v30 = vadd.f32 %v2213_v60, %v1309_v43  }
 0x5ad   : >> { %v1208_v15 = vpop.f32.mrf.mxu3 }
 0x5ae   : >> { %v1209_v58 = vadd.f32 %v1208_v15, %v2703_v0  ;;  %1341 = vst [vmem:[%s2538_s22 + $0x60] sm:$0xff] (%p3163_p1), %v1325_v30 }
 0x5b0   : >> { %v1293_v28 = vadd.f32 %v3038_v1, %v1209_v58  ;;  %v3378_v58 = vmov %v1323_v44 }
 0x5b2   : >> { %v1310_v8 = vmul.f32 %v3079_v13, %v1293_v28 }
 0x5b4   : >> { %v1326_v50 = vadd.f32 %v2209_v61, %v1310_v8  }
 0x5b5   : >> { %v1211_v14 = vpop.f32.mrf.mxu3 }
 0x5b6   : >> { %v1212_v59 = vadd.f32 %v1211_v14, %v2703_v0  ;;  %v3375_v61 = vmov %v1326_v50  ;;  %v3387_v14 = vmov %v3364_v41  ;;  %1342 = vst [vmem:[%s2538_s22 + $0x68] sm:$0xff] (%p3163_p1), %v1326_v50 }
 0x5b8   : >> { %v1294_v23 = vadd.f32 %v3043_v16, %v1212_v59  ;;  %v3377_v59 = vmov %v1324_v26 }
 0x5ba   : >> { %v1311_v11 = vmul.f32 %v3079_v13, %v1294_v23 }
 0x5bc   : >> { %v1327_v51 = vadd.f32 %v2205_v62, %v1311_v11  }
 0x5bd   : >> { %v1213_v18 = vpop.f32.mrf.mxu3 }
 0x5be   : >> { %v1214_v60 = vadd.f32 %v1213_v18, %v2703_v0  ;;  %v3374_v62 = vmov %v1327_v51  ;;  %v3386_v18 = vmov %v3365_v38  ;;  %1343 = vst [vmem:[%s2538_s22 + $0x70] sm:$0xff] (%p3163_p1), %v1327_v51 }
 0x5c0   : >> { %v1295_v33 = vadd.f32 %v3052_v9, %v1214_v60  ;;  %v3376_v60 = vmov %v1325_v30 }
 0x5c2   : >> { %v1312_v1 = vmul.f32 %v3079_v13, %v1295_v33  ;;  %365 = sbr.rel (!%p3163_p1) target bundleno = 140 (0x8c), region = 100 }
 0x5c4   : >> { %v1328_v7 = vadd.f32 %v3361_v47, %v1312_v1  }
 0x5c6   : >> { %v3373_v63 = vmov %v1328_v7  ;;  %1344 = vst [vmem:[%s2538_s22 + $0x78] sm:$0xff] (%p3163_p1), %v1328_v7 }
 0x5c7   : > { %2084 = shalt.err (!%p2081_p12)
}
 0x5c8   : > { %s2276_s15 = smov 128   ;;  %s2277_s22 = smov 8  }
 0x5c9   : > { %1621 = dma.vmem_to_hbm [thread:$0]  (%p2382_p3), %s1359_s0, 2048, %s1361_s13, %s1346_s8, %s2276_s15, %s2276_s15, %s2277_s22  }
 0x5ca PF: > { %s1375_s19 = sand.u32 1, %s2185_s25   ;;  %p3389_p13 = scmp.ge.s32.totalorder %s2197_s28, 2 }
 0x5cb   : > { %s1376_s18 = scalar_lea.sflag [#allocation6], %s1375_s19 }
 0x5cc   : > { %p1635_p0 = pnand %p3389_p13, %p2351_p6 }
 0x5ce   : > { %p1636_p5 = pneg %p1635_p0 }
 0x5d0   : > { %2180 = dma.done.wait (%p1636_p5), %s1376_s18, 2048  }
 0x5d1   : > { %2182 = vsyncadd (%p1636_p5), %s1376_s18, 4294965248  ;;  %p28_p7 = scmp.ge.s32.totalorder %s2372_s21, 4   ;;  %s3390_s25 = smov %s2189_s26 }
 0x5d2   : > { %s3391_s26 = smov %s2193_s27  ;;  %s3392_s27 = smov %s2388_s29 }
 0x5d3   : > { %s3393_s28 = smov %s2372_s21  ;;  %30 = sbr.rel (!%p28_p7) target bundleno = 12 (0xc), region = 111 }
 0x5d8   :  { %1382 = vsyncpa [#allocation5], 1 }
 0x5d9   :  { %1384 = vsyncpa [#allocation5 + $0x1], 1 }
 0x5da   :  { %1385 = vsyncpa [#allocation8], 1 }
 0x5db   :  { %1386 = vsyncpa [#allocation6], 1 }
 0x5dc   :  { %1388 = vsyncpa [#allocation6 + $0x1], 1 }

</bundles_post_ra>
